<compile_context>
chip_gen: v5e
topology: v5e:2x2
jax: 0.10.0
libtpu: 0.0.40
codegen_flags: <defaults>
</compile_context>

<pallas_src>
import math

import jax
import jax.numpy as jnp
from jax import lax
from jax.experimental import pallas as pl
from jax.experimental.pallas import tpu as pltpu

# ----- Synthetic "mini-BERT" config (stand-in for distilbert-base-uncased) ----
VOCAB = 100
MAX_POS = 16
HIDDEN = 128          # hidden size (lane-aligned)
NUM_HEADS = 2
HEAD_DIM = HIDDEN // NUM_HEADS
INTERMEDIATE = 256
NUM_LAYERS = 2
NUM_CLASSES = 2
CLS_HIDDEN = 128      # classifier intermediate size (matches nn.Linear(H, 128))
LOGITS_PAD = 128      # lane-dense classifier output width (>= NUM_CLASSES)
LN_EPS = 1e-12


# ----------------------------- Fused Pallas kernel ----------------------------
def fused_forward_kernel(emb_ref, bias_ref, eg_ref, eb_ref,
                         wqkv_ref, bqkv_ref, wo_ref, bo_ref,
                         ln1g_ref, ln1b_ref, w1_ref, b1_ref, w2_ref, b2_ref,
                         ln2g_ref, ln2b_ref,
                         cw1_ref, cb1_ref, cw2_ref, cb2_ref,
                         out_ref):
    """One grid step = one sequence: LN(emb) -> L encoder layers -> CLS head."""
    f32, bf16 = jnp.float32, jnp.bfloat16

    def layer_norm(v, g, b):                      # f32 elementwise (VPU/EUP)
        mu = jnp.mean(v, axis=-1, keepdims=True)
        var = jnp.mean((v - mu) ** 2, axis=-1, keepdims=True)
        return (v - mu) * lax.rsqrt(var + LN_EPS) * g + b

    def mdot(a, w):                               # 2-D matmul, bf16 in, f32 acc
        return jnp.dot(a.astype(bf16), w.astype(bf16),
                       preferred_element_type=f32)

    x = layer_norm(emb_ref[...], eg_ref[...], eb_ref[...])        # (S, H) f32
    bias = bias_ref[...]                                          # (1, S) key-pad bias
    scale = 1.0 / math.sqrt(HEAD_DIM)

    for l in range(NUM_LAYERS):                   # static unrolled (L = 2)
        # ---- self-attention: single lane-dense QKV matmul (S,H)@(H,3H) -------
        qkv = mdot(x, wqkv_ref[l]) + bqkv_ref[l]                  # (S, 3H) f32

        ctx_heads = []
        for h in range(NUM_HEADS):                # static, NH = 2
            q = qkv[:, h * HEAD_DIM:(h + 1) * HEAD_DIM].astype(bf16)
            k = qkv[:, HIDDEN + h * HEAD_DIM:
                       HIDDEN + (h + 1) * HEAD_DIM].astype(bf16)
            v = qkv[:, 2 * HIDDEN + h * HEAD_DIM:
                       2 * HIDDEN + (h + 1) * HEAD_DIM].astype(bf16)
            # scores q·kᵀ (S,S), f32 softmax with key-padding bias
            s = lax.dot_general(q, k, (((1,), (1,)), ((), ())),
                                preferred_element_type=f32) * scale + bias
            s = s - jnp.max(s, axis=-1, keepdims=True)
            e = jnp.exp(s)
            p = e / jnp.sum(e, axis=-1, keepdims=True)            # exact softmax
            ctx_heads.append(jnp.dot(p.astype(bf16), v,
                                     preferred_element_type=f32))  # (S, Dh)

        # head merge fused into the O-projection: one full-K (K=H) MXU matmul
        ctx = jnp.concatenate(ctx_heads, axis=-1)                 # (S, H)
        attn = mdot(ctx, wo_ref[l]) + bo_ref[l]                   # (S, H)
        x1 = layer_norm(x + attn, ln1g_ref[l], ln1b_ref[l])

        # ---- feed-forward ----------------------------------------------------
        # TODO(synk): BERT uses exact (erf) GELU; tanh approximation used here.
        h1 = jax.nn.gelu(mdot(x1, w1_ref[l]) + b1_ref[l], approximate=True)
        h2 = mdot(h1, w2_ref[l]) + b2_ref[l]
        x = layer_norm(x1 + h2, ln2g_ref[l], ln2b_ref[l])

    # ---- classifier head on the CLS row only (dropout = identity at eval) ----
    cls = x[0:1, :]                                               # (1, H)
    hc = jnp.maximum(mdot(cls, cw1_ref[...]) + cb1_ref[...], 0.0)
    out_ref[...] = mdot(hc, cw2_ref[...]) + cb2_ref[...]          # (1, LOGITS_PAD)


# ------------------------------- Wrapper ---------------------------------------
def _full_spec(shape):
    """Whole-array VMEM block with a constant index map (loaded once)."""
    ndim = len(shape)
    return pl.BlockSpec(shape, lambda b, _n=ndim: (0,) * _n)


@jax.jit
def spam_classifier_forward(kp, input_ids, attention_mask):
    B, S = input_ids.shape

    # Embeddings (gather is XLA glue; everything after is one Pallas kernel).
    word = jnp.take(kp["word_emb"], input_ids, axis=0)              # (B,S,H)
    pos = jnp.take(kp["pos_emb"], jnp.arange(S), axis=0)[None]      # (1,S,H)
    typ = kp["type_emb"][0][None, None, :]                          # (1,1,H)
    emb = (word + pos + typ).astype(jnp.float32)                    # (B,S,H)

    # Additive key-padding bias: 0 where key is kept, -1e9 where masked. (B,1,S)
    attn_bias = ((attention_mask.astype(jnp.float32) - 1.0) * 1e9).reshape(B, 1, S)

    weights = (kp["emb_ln_g"], kp["emb_ln_b"],
               kp["wqkv"], kp["bqkv"], kp["wo"], kp["bo"],
               kp["ln1_g"], kp["ln1_b"], kp["w1"], kp["b1"], kp["w2"], kp["b2"],
               kp["ln2_g"], kp["ln2_b"],
               kp["cls_w1"], kp["cls_b1"], kp["cls_w2"], kp["cls_b2"])

    # Advisory cost estimate (per call, all batches).
    flops_layer = (2 * S * HIDDEN * 3 * HIDDEN            # QKV
                   + NUM_HEADS * 4 * S * S * HEAD_DIM     # QK^T + PV
                   + 2 * S * HIDDEN * HIDDEN              # O-proj
                   + 4 * S * HIDDEN * INTERMEDIATE)       # FFN
    flops = B * (NUM_LAYERS * flops_layer
                 + 2 * HIDDEN * CLS_HIDDEN + 2 * CLS_HIDDEN * LOGITS_PAD)
    transcendentals = B * NUM_LAYERS * (NUM_HEADS * S * S + S * INTERMEDIATE)
    bytes_accessed = (sum(int(a.size) * a.dtype.itemsize
                          for a in (emb, attn_bias) + weights)
                      + B * LOGITS_PAD * 4)

    out = pl.pallas_call(
        fused_forward_kernel,
        out_shape=jax.ShapeDtypeStruct((B, 1, LOGITS_PAD), jnp.float32),
        grid=(B,),
        in_specs=[pl.BlockSpec((None, S, HIDDEN), lambda b: (b, 0, 0)),   # emb
                  pl.BlockSpec((None, 1, S), lambda b: (b, 0, 0))]        # bias
                 + [_full_spec(w.shape) for w in weights],
        out_specs=pl.BlockSpec((None, 1, LOGITS_PAD), lambda b: (b, 0, 0)),
        compiler_params=pltpu.CompilerParams(
            dimension_semantics=("parallel",),
            vmem_limit_bytes=32 * 1024 * 1024),
        cost_estimate=pl.CostEstimate(flops=flops,
                                      transcendentals=transcendentals,
                                      bytes_accessed=bytes_accessed),
    )(emb, attn_bias, *weights)

    # First NUM_CLASSES (real) logits of each sequence's CLS row.
    return out.reshape(B, LOGITS_PAD)[:, :NUM_CLASSES]


# --------------------------- Parameter construction ----------------------------
def init_params(key):
    """Standard (PyTorch-like) layout parameters."""
    def nrm(k, shape, scale=0.02):
        return (scale * jax.random.normal(k, shape)).astype(jnp.float32)

    keys = iter(jax.random.split(key, 128))
    params = {
        "word_emb": nrm(next(keys), (VOCAB, HIDDEN)),
        "pos_emb": nrm(next(keys), (MAX_POS, HIDDEN)),
        "type_emb": nrm(next(keys), (2, HIDDEN)),
        "emb_ln_g": jnp.ones((1, HIDDEN), jnp.float32),
        "emb_ln_b": jnp.zeros((1, HIDDEN), jnp.float32),
        "layers": [],
        # classifier head: Linear(H, 128) -> ReLU -> Linear(128, num_classes)
        "cls_w1": nrm(next(keys), (HIDDEN, CLS_HIDDEN)),
        "cls_b1": jnp.zeros((1, CLS_HIDDEN), jnp.float32),
        "cls_w2": nrm(next(keys), (CLS_HIDDEN, NUM_CLASSES)),
        "cls_b2": jnp.zeros((1, NUM_CLASSES), jnp.float32),
    }
    for _ in range(NUM_LAYERS):
        params["layers"].append({
            "wq": nrm(next(keys), (HIDDEN, HIDDEN)),
            "bq": jnp.zeros((1, HIDDEN), jnp.float32),
            "wk": nrm(next(keys), (HIDDEN, HIDDEN)),
            "bk": jnp.zeros((1, HIDDEN), jnp.float32),
            "wv": nrm(next(keys), (HIDDEN, HIDDEN)),
            "bv": jnp.zeros((1, HIDDEN), jnp.float32),
            "wo": nrm(next(keys), (HIDDEN, HIDDEN)),
            "bo": jnp.zeros((1, HIDDEN), jnp.float32),
            "ln1_g": jnp.ones((1, HIDDEN), jnp.float32),
            "ln1_b": jnp.zeros((1, HIDDEN), jnp.float32),
            "w1": nrm(next(keys), (HIDDEN, INTERMEDIATE)),
            "b1": jnp.zeros((1, INTERMEDIATE), jnp.float32),
            "w2": nrm(next(keys), (INTERMEDIATE, HIDDEN)),
            "b2": jnp.zeros((1, HIDDEN), jnp.float32),
            "ln2_g": jnp.ones((1, HIDDEN), jnp.float32),
            "ln2_b": jnp.zeros((1, HIDDEN), jnp.float32),
        })
    return params


def prepare_kernel_params(p):
    """One-time prep: pack Wq|Wk|Wv into a single lane-dense (H, 3H) matrix per
    layer, stack weights over layers, cast matmul weights to bf16, and zero-pad
    the final classifier weight to a lane-dense width."""
    bf16 = jnp.bfloat16

    wqkv, bqkv, wo, bo = [], [], [], []
    ln1g, ln1b, w1, b1, w2, b2, ln2g, ln2b = [], [], [], [], [], [], [], []
    for lp in p["layers"]:
        wqkv.append(jnp.concatenate([lp["wq"], lp["wk"], lp["wv"]], axis=1))  # (H,3H)
        bqkv.append(jnp.concatenate([lp["bq"], lp["bk"], lp["bv"]], axis=1))  # (1,3H)
        wo.append(lp["wo"]); bo.append(lp["bo"])
        ln1g.append(lp["ln1_g"]); ln1b.append(lp["ln1_b"])
        w1.append(lp["w1"]); b1.append(lp["b1"])
        w2.append(lp["w2"]); b2.append(lp["b2"])
        ln2g.append(lp["ln2_g"]); ln2b.append(lp["ln2_b"])

    stack = lambda xs: jnp.stack(xs, axis=0)
    cls_w2p = jnp.zeros((CLS_HIDDEN, LOGITS_PAD), jnp.float32)
    cls_w2p = cls_w2p.at[:, :NUM_CLASSES].set(p["cls_w2"])
    cls_b2p = jnp.zeros((1, LOGITS_PAD), jnp.float32)
    cls_b2p = cls_b2p.at[:, :NUM_CLASSES].set(p["cls_b2"])

    return {
        "word_emb": p["word_emb"], "pos_emb": p["pos_emb"], "type_emb": p["type_emb"],
        "emb_ln_g": p["emb_ln_g"], "emb_ln_b": p["emb_ln_b"],
        "wqkv": stack(wqkv).astype(bf16),   # (L, H, 3H)
        "bqkv": stack(bqkv),                # (L, 1, 3H) f32
        "wo": stack(wo).astype(bf16),       # (L, H, H)
        "bo": stack(bo),                    # (L, 1, H)
        "ln1_g": stack(ln1g), "ln1_b": stack(ln1b),
        "w1": stack(w1).astype(bf16), "b1": stack(b1),
        "w2": stack(w2).astype(bf16), "b2": stack(b2),
        "ln2_g": stack(ln2g), "ln2_b": stack(ln2b),
        "cls_w1": p["cls_w1"].astype(bf16), "cls_b1": p["cls_b1"],
        "cls_w2": cls_w2p.astype(bf16), "cls_b2": cls_b2p,
    }


# ----------------------------------- Main ---------------------------------------
if __name__ == "__main__":
    key = jax.random.PRNGKey(0)
    k_param, k_ids = jax.random.split(key)

    B, S = 2, 8
    params = init_params(k_param)
    kparams = prepare_kernel_params(params)

    input_ids = jax.random.randint(k_ids, (B, S), 0, VOCAB, dtype=jnp.int32)
    attention_mask = jnp.array(
        [[1, 1, 1, 1, 1, 1, 1, 1],
         [1, 1, 1, 1, 1, 1, 0, 0]], dtype=jnp.int32)

    logits = spam_classifier_forward(kparams, input_ids, attention_mask)
    logits = jax.block_until_ready(logits)
    assert logits.shape == (B, NUM_CLASSES)
    assert bool(jnp.all(jnp.isfinite(logits)))
    print("KERNEL_OK")
</pallas_src>

<mosaic_0001>
module attributes {stable_mosaic.version = 11 : i64} {
  func.func @fused_forward_kernel(%arg0: i32, %arg1: memref<1x8x128xf32, #tpu.memory_space<vmem>>, %arg2: memref<1x1x8xf32, #tpu.memory_space<vmem>>, %arg3: memref<1x128xf32, #tpu.memory_space<vmem>>, %arg4: memref<1x128xf32, #tpu.memory_space<vmem>>, %arg5: memref<2x128x384xbf16, #tpu.memory_space<vmem>>, %arg6: memref<2x1x384xf32, #tpu.memory_space<vmem>>, %arg7: memref<2x128x128xbf16, #tpu.memory_space<vmem>>, %arg8: memref<2x1x128xf32, #tpu.memory_space<vmem>>, %arg9: memref<2x1x128xf32, #tpu.memory_space<vmem>>, %arg10: memref<2x1x128xf32, #tpu.memory_space<vmem>>, %arg11: memref<2x128x256xbf16, #tpu.memory_space<vmem>>, %arg12: memref<2x1x256xf32, #tpu.memory_space<vmem>>, %arg13: memref<2x256x128xbf16, #tpu.memory_space<vmem>>, %arg14: memref<2x1x128xf32, #tpu.memory_space<vmem>>, %arg15: memref<2x1x128xf32, #tpu.memory_space<vmem>>, %arg16: memref<2x1x128xf32, #tpu.memory_space<vmem>>, %arg17: memref<128x128xbf16, #tpu.memory_space<vmem>>, %arg18: memref<1x128xf32, #tpu.memory_space<vmem>>, %arg19: memref<128x128xbf16, #tpu.memory_space<vmem>>, %arg20: memref<1x128xf32, #tpu.memory_space<vmem>>, %arg21: memref<1x1x128xf32, #tpu.memory_space<vmem>>) attributes {dimension_semantics = [#tpu.dimension_semantics<parallel>], iteration_bounds = array<i64: 2>, scalar_prefetch = 0 : i64, scratch_operands = 0 : i64, tpu.core_type = #tpu.core_type<tc>, window_params = [{transform_indices = @transform_0, window_bounds = array<i64: 1, 8, 128>}, {transform_indices = @transform_1, window_bounds = array<i64: 1, 1, 8>}, {pipeline_mode = #tpu.pipeline_mode<synchronous>, transform_indices = @transform_2, window_bounds = array<i64: 1, 128>}, {pipeline_mode = #tpu.pipeline_mode<synchronous>, transform_indices = @transform_3, window_bounds = array<i64: 1, 128>}, {pipeline_mode = #tpu.pipeline_mode<synchronous>, transform_indices = @transform_4, window_bounds = array<i64: 2, 128, 384>}, {pipeline_mode = #tpu.pipeline_mode<synchronous>, transform_indices = @transform_5, window_bounds = array<i64: 2, 1, 384>}, {pipeline_mode = #tpu.pipeline_mode<synchronous>, transform_indices = @transform_6, window_bounds = array<i64: 2, 128, 128>}, {pipeline_mode = #tpu.pipeline_mode<synchronous>, transform_indices = @transform_7, window_bounds = array<i64: 2, 1, 128>}, {pipeline_mode = #tpu.pipeline_mode<synchronous>, transform_indices = @transform_8, window_bounds = array<i64: 2, 1, 128>}, {pipeline_mode = #tpu.pipeline_mode<synchronous>, transform_indices = @transform_9, window_bounds = array<i64: 2, 1, 128>}, {pipeline_mode = #tpu.pipeline_mode<synchronous>, transform_indices = @transform_10, window_bounds = array<i64: 2, 128, 256>}, {pipeline_mode = #tpu.pipeline_mode<synchronous>, transform_indices = @transform_11, window_bounds = array<i64: 2, 1, 256>}, {pipeline_mode = #tpu.pipeline_mode<synchronous>, transform_indices = @transform_12, window_bounds = array<i64: 2, 256, 128>}, {pipeline_mode = #tpu.pipeline_mode<synchronous>, transform_indices = @transform_13, window_bounds = array<i64: 2, 1, 128>}, {pipeline_mode = #tpu.pipeline_mode<synchronous>, transform_indices = @transform_14, window_bounds = array<i64: 2, 1, 128>}, {pipeline_mode = #tpu.pipeline_mode<synchronous>, transform_indices = @transform_15, window_bounds = array<i64: 2, 1, 128>}, {pipeline_mode = #tpu.pipeline_mode<synchronous>, transform_indices = @transform_16, window_bounds = array<i64: 128, 128>}, {pipeline_mode = #tpu.pipeline_mode<synchronous>, transform_indices = @transform_17, window_bounds = array<i64: 1, 128>}, {pipeline_mode = #tpu.pipeline_mode<synchronous>, transform_indices = @transform_18, window_bounds = array<i64: 128, 128>}, {pipeline_mode = #tpu.pipeline_mode<synchronous>, transform_indices = @transform_19, window_bounds = array<i64: 1, 128>}, {transform_indices = @transform_20, window_bounds = array<i64: 1, 1, 128>}]} {
    %c0 = arith.constant 0 : index
    %c0_0 = arith.constant 0 : index
    %c0_1 = arith.constant 0 : index
    %0 = vector.load %arg1[%c0, %c0_0, %c0_1] : memref<1x8x128xf32, #tpu.memory_space<vmem>>, vector<1x8x128xf32>
    %1 = vector.shape_cast %0 : vector<1x8x128xf32> to vector<8x128xf32>
    %c0_2 = arith.constant 0 : index
    %c0_3 = arith.constant 0 : index
    %2 = vector.load %arg3[%c0_2, %c0_3] : memref<1x128xf32, #tpu.memory_space<vmem>>, vector<1x128xf32>
    %c0_4 = arith.constant 0 : index
    %c0_5 = arith.constant 0 : index
    %3 = vector.load %arg4[%c0_4, %c0_5] : memref<1x128xf32, #tpu.memory_space<vmem>>, vector<1x128xf32>
    %cst = arith.constant dense<0.000000e+00> : vector<8xf32>
    %4 = vector.multi_reduction <add>, %1, %cst [1] : vector<8x128xf32> to vector<8xf32>
    %5 = vector.shape_cast %4 : vector<8xf32> to vector<8x1xf32>
    %cst_6 = arith.constant 1.280000e+02 : f32
    %6 = vector.broadcast %cst_6 : f32 to vector<8x1xf32>
    %7 = arith.divf %5, %6 : vector<8x1xf32>
    %8 = vector.broadcast %7 : vector<8x1xf32> to vector<8x128xf32>
    %9 = arith.subf %1, %8 : vector<8x128xf32>
    %10 = arith.mulf %9, %9 : vector<8x128xf32>
    %cst_7 = arith.constant dense<0.000000e+00> : vector<8xf32>
    %11 = vector.multi_reduction <add>, %10, %cst_7 [1] : vector<8x128xf32> to vector<8xf32>
    %12 = vector.shape_cast %11 : vector<8xf32> to vector<8x1xf32>
    %cst_8 = arith.constant 1.280000e+02 : f32
    %13 = vector.broadcast %cst_8 : f32 to vector<8x1xf32>
    %14 = arith.divf %12, %13 : vector<8x1xf32>
    %15 = vector.broadcast %7 : vector<8x1xf32> to vector<8x128xf32>
    %16 = arith.subf %1, %15 : vector<8x128xf32>
    %cst_9 = arith.constant 9.99999996E-13 : f32
    %17 = vector.broadcast %cst_9 : f32 to vector<8x1xf32>
    %18 = arith.addf %14, %17 : vector<8x1xf32>
    %19 = math.rsqrt %18 : vector<8x1xf32>
    %20 = vector.broadcast %19 : vector<8x1xf32> to vector<8x128xf32>
    %21 = arith.mulf %16, %20 : vector<8x128xf32>
    %22 = vector.broadcast %2 : vector<1x128xf32> to vector<8x128xf32>
    %23 = arith.mulf %21, %22 : vector<8x128xf32>
    %24 = vector.broadcast %3 : vector<1x128xf32> to vector<8x128xf32>
    %25 = arith.addf %23, %24 : vector<8x128xf32>
    %c0_10 = arith.constant 0 : index
    %c0_11 = arith.constant 0 : index
    %c0_12 = arith.constant 0 : index
    %26 = vector.load %arg2[%c0_10, %c0_11, %c0_12] : memref<1x1x8xf32, #tpu.memory_space<vmem>>, vector<1x1x8xf32>
    %27 = vector.shape_cast %26 : vector<1x1x8xf32> to vector<1x8xf32>
    %c0_13 = arith.constant 0 : index
    %c0_14 = arith.constant 0 : index
    %c0_15 = arith.constant 0 : index
    %28 = vector.load %arg5[%c0_13, %c0_14, %c0_15] : memref<2x128x384xbf16, #tpu.memory_space<vmem>>, vector<1x128x384xbf16>
    %29 = vector.shape_cast %28 : vector<1x128x384xbf16> to vector<128x384xbf16>
    %30 = arith.truncf %25 : vector<8x128xf32> to vector<8x128xbf16>
    %cst_16 = arith.constant dense<0.000000e+00> : vector<8x384xf32>
    %31 = tpu.matmul %30, %29, %cst_16 {dimension_numbers = #tpu.dot_dimension_numbers<[1], [0], [0], [1], [0, 0, 1, 1], [], []>} : vector<8x128xbf16>, vector<128x384xbf16>, vector<8x384xf32> -> vector<8x384xf32>
    %c0_17 = arith.constant 0 : index
    %c0_18 = arith.constant 0 : index
    %c0_19 = arith.constant 0 : index
    %32 = vector.load %arg6[%c0_17, %c0_18, %c0_19] : memref<2x1x384xf32, #tpu.memory_space<vmem>>, vector<1x1x384xf32>
    %33 = vector.shape_cast %32 : vector<1x1x384xf32> to vector<1x384xf32>
    %34 = vector.broadcast %33 : vector<1x384xf32> to vector<8x384xf32>
    %35 = arith.addf %31, %34 : vector<8x384xf32>
    %36 = vector.extract_strided_slice %35 {offsets = [0, 0], sizes = [8, 64], strides = [1, 1]} : vector<8x384xf32> to vector<8x64xf32>
    %37 = arith.truncf %36 : vector<8x64xf32> to vector<8x64xbf16>
    %38 = vector.extract_strided_slice %35 {offsets = [0, 128], sizes = [8, 64], strides = [1, 1]} : vector<8x384xf32> to vector<8x64xf32>
    %39 = arith.truncf %38 : vector<8x64xf32> to vector<8x64xbf16>
    %40 = vector.extract_strided_slice %35 {offsets = [0, 256], sizes = [8, 64], strides = [1, 1]} : vector<8x384xf32> to vector<8x64xf32>
    %41 = arith.truncf %40 : vector<8x64xf32> to vector<8x64xbf16>
    %cst_20 = arith.constant dense<0.000000e+00> : vector<8x8xf32>
    %42 = tpu.matmul %37, %39, %cst_20 {dimension_numbers = #tpu.dot_dimension_numbers<[1], [1], [0], [0], [0, 0, 1, 0], [], []>} : vector<8x64xbf16>, vector<8x64xbf16>, vector<8x8xf32> -> vector<8x8xf32>
    %cst_21 = arith.constant 1.250000e-01 : f32
    %43 = vector.broadcast %cst_21 : f32 to vector<8x8xf32>
    %44 = arith.mulf %42, %43 : vector<8x8xf32>
    %45 = vector.broadcast %27 : vector<1x8xf32> to vector<8x8xf32>
    %46 = arith.addf %44, %45 : vector<8x8xf32>
    %cst_22 = arith.constant dense<0xFF800000> : vector<8xf32>
    %47 = vector.multi_reduction <maximumf>, %46, %cst_22 [1] : vector<8x8xf32> to vector<8xf32>
    %48 = vector.shape_cast %47 : vector<8xf32> to vector<8x1xf32>
    %49 = vector.broadcast %48 : vector<8x1xf32> to vector<8x8xf32>
    %50 = arith.subf %46, %49 : vector<8x8xf32>
    %51 = math.exp %50 : vector<8x8xf32>
    %cst_23 = arith.constant dense<0.000000e+00> : vector<8xf32>
    %52 = vector.multi_reduction <add>, %51, %cst_23 [1] : vector<8x8xf32> to vector<8xf32>
    %53 = vector.shape_cast %52 : vector<8xf32> to vector<8x1xf32>
    %54 = vector.broadcast %53 : vector<8x1xf32> to vector<8x8xf32>
    %55 = arith.divf %51, %54 : vector<8x8xf32>
    %56 = arith.truncf %55 : vector<8x8xf32> to vector<8x8xbf16>
    %cst_24 = arith.constant dense<0.000000e+00> : vector<8x64xf32>
    %57 = tpu.matmul %56, %41, %cst_24 {dimension_numbers = #tpu.dot_dimension_numbers<[1], [0], [0], [1], [0, 0, 1, 1], [], []>} : vector<8x8xbf16>, vector<8x64xbf16>, vector<8x64xf32> -> vector<8x64xf32>
    %58 = vector.extract_strided_slice %35 {offsets = [0, 64], sizes = [8, 64], strides = [1, 1]} : vector<8x384xf32> to vector<8x64xf32>
    %59 = arith.truncf %58 : vector<8x64xf32> to vector<8x64xbf16>
    %60 = vector.extract_strided_slice %35 {offsets = [0, 192], sizes = [8, 64], strides = [1, 1]} : vector<8x384xf32> to vector<8x64xf32>
    %61 = arith.truncf %60 : vector<8x64xf32> to vector<8x64xbf16>
    %62 = vector.extract_strided_slice %35 {offsets = [0, 320], sizes = [8, 64], strides = [1, 1]} : vector<8x384xf32> to vector<8x64xf32>
    %63 = arith.truncf %62 : vector<8x64xf32> to vector<8x64xbf16>
    %cst_25 = arith.constant dense<0.000000e+00> : vector<8x8xf32>
    %64 = tpu.matmul %59, %61, %cst_25 {dimension_numbers = #tpu.dot_dimension_numbers<[1], [1], [0], [0], [0, 0, 1, 0], [], []>} : vector<8x64xbf16>, vector<8x64xbf16>, vector<8x8xf32> -> vector<8x8xf32>
    %cst_26 = arith.constant 1.250000e-01 : f32
    %65 = vector.broadcast %cst_26 : f32 to vector<8x8xf32>
    %66 = arith.mulf %64, %65 : vector<8x8xf32>
    %67 = vector.broadcast %27 : vector<1x8xf32> to vector<8x8xf32>
    %68 = arith.addf %66, %67 : vector<8x8xf32>
    %cst_27 = arith.constant dense<0xFF800000> : vector<8xf32>
    %69 = vector.multi_reduction <maximumf>, %68, %cst_27 [1] : vector<8x8xf32> to vector<8xf32>
    %70 = vector.shape_cast %69 : vector<8xf32> to vector<8x1xf32>
    %71 = vector.broadcast %70 : vector<8x1xf32> to vector<8x8xf32>
    %72 = arith.subf %68, %71 : vector<8x8xf32>
    %73 = math.exp %72 : vector<8x8xf32>
    %cst_28 = arith.constant dense<0.000000e+00> : vector<8xf32>
    %74 = vector.multi_reduction <add>, %73, %cst_28 [1] : vector<8x8xf32> to vector<8xf32>
    %75 = vector.shape_cast %74 : vector<8xf32> to vector<8x1xf32>
    %76 = vector.broadcast %75 : vector<8x1xf32> to vector<8x8xf32>
    %77 = arith.divf %73, %76 : vector<8x8xf32>
    %78 = arith.truncf %77 : vector<8x8xf32> to vector<8x8xbf16>
    %cst_29 = arith.constant dense<0.000000e+00> : vector<8x64xf32>
    %79 = tpu.matmul %78, %63, %cst_29 {dimension_numbers = #tpu.dot_dimension_numbers<[1], [0], [0], [1], [0, 0, 1, 1], [], []>} : vector<8x8xbf16>, vector<8x64xbf16>, vector<8x64xf32> -> vector<8x64xf32>
    %80 = tpu.concatenate %57, %79 in 1 : vector<8x64xf32>, vector<8x64xf32> -> vector<8x128xf32>
    %c0_30 = arith.constant 0 : index
    %c0_31 = arith.constant 0 : index
    %c0_32 = arith.constant 0 : index
    %81 = vector.load %arg7[%c0_30, %c0_31, %c0_32] : memref<2x128x128xbf16, #tpu.memory_space<vmem>>, vector<1x128x128xbf16>
    %82 = vector.shape_cast %81 : vector<1x128x128xbf16> to vector<128x128xbf16>
    %83 = arith.truncf %80 : vector<8x128xf32> to vector<8x128xbf16>
    %cst_33 = arith.constant dense<0.000000e+00> : vector<8x128xf32>
    %84 = tpu.matmul %83, %82, %cst_33 {dimension_numbers = #tpu.dot_dimension_numbers<[1], [0], [0], [1], [0, 0, 1, 1], [], []>} : vector<8x128xbf16>, vector<128x128xbf16>, vector<8x128xf32> -> vector<8x128xf32>
    %c0_34 = arith.constant 0 : index
    %c0_35 = arith.constant 0 : index
    %c0_36 = arith.constant 0 : index
    %85 = vector.load %arg8[%c0_34, %c0_35, %c0_36] : memref<2x1x128xf32, #tpu.memory_space<vmem>>, vector<1x1x128xf32>
    %86 = vector.shape_cast %85 : vector<1x1x128xf32> to vector<1x128xf32>
    %87 = vector.broadcast %86 : vector<1x128xf32> to vector<8x128xf32>
    %88 = arith.addf %84, %87 : vector<8x128xf32>
    %89 = arith.addf %25, %88 : vector<8x128xf32>
    %c0_37 = arith.constant 0 : index
    %c0_38 = arith.constant 0 : index
    %c0_39 = arith.constant 0 : index
    %90 = vector.load %arg9[%c0_37, %c0_38, %c0_39] : memref<2x1x128xf32, #tpu.memory_space<vmem>>, vector<1x1x128xf32>
    %91 = vector.shape_cast %90 : vector<1x1x128xf32> to vector<1x128xf32>
    %c0_40 = arith.constant 0 : index
    %c0_41 = arith.constant 0 : index
    %c0_42 = arith.constant 0 : index
    %92 = vector.load %arg10[%c0_40, %c0_41, %c0_42] : memref<2x1x128xf32, #tpu.memory_space<vmem>>, vector<1x1x128xf32>
    %93 = vector.shape_cast %92 : vector<1x1x128xf32> to vector<1x128xf32>
    %cst_43 = arith.constant dense<0.000000e+00> : vector<8xf32>
    %94 = vector.multi_reduction <add>, %89, %cst_43 [1] : vector<8x128xf32> to vector<8xf32>
    %95 = vector.shape_cast %94 : vector<8xf32> to vector<8x1xf32>
    %cst_44 = arith.constant 1.280000e+02 : f32
    %96 = vector.broadcast %cst_44 : f32 to vector<8x1xf32>
    %97 = arith.divf %95, %96 : vector<8x1xf32>
    %98 = vector.broadcast %97 : vector<8x1xf32> to vector<8x128xf32>
    %99 = arith.subf %89, %98 : vector<8x128xf32>
    %100 = arith.mulf %99, %99 : vector<8x128xf32>
    %cst_45 = arith.constant dense<0.000000e+00> : vector<8xf32>
    %101 = vector.multi_reduction <add>, %100, %cst_45 [1] : vector<8x128xf32> to vector<8xf32>
    %102 = vector.shape_cast %101 : vector<8xf32> to vector<8x1xf32>
    %cst_46 = arith.constant 1.280000e+02 : f32
    %103 = vector.broadcast %cst_46 : f32 to vector<8x1xf32>
    %104 = arith.divf %102, %103 : vector<8x1xf32>
    %105 = vector.broadcast %97 : vector<8x1xf32> to vector<8x128xf32>
    %106 = arith.subf %89, %105 : vector<8x128xf32>
    %cst_47 = arith.constant 9.99999996E-13 : f32
    %107 = vector.broadcast %cst_47 : f32 to vector<8x1xf32>
    %108 = arith.addf %104, %107 : vector<8x1xf32>
    %109 = math.rsqrt %108 : vector<8x1xf32>
    %110 = vector.broadcast %109 : vector<8x1xf32> to vector<8x128xf32>
    %111 = arith.mulf %106, %110 : vector<8x128xf32>
    %112 = vector.broadcast %91 : vector<1x128xf32> to vector<8x128xf32>
    %113 = arith.mulf %111, %112 : vector<8x128xf32>
    %114 = vector.broadcast %93 : vector<1x128xf32> to vector<8x128xf32>
    %115 = arith.addf %113, %114 : vector<8x128xf32>
    %c0_48 = arith.constant 0 : index
    %c0_49 = arith.constant 0 : index
    %c0_50 = arith.constant 0 : index
    %116 = vector.load %arg11[%c0_48, %c0_49, %c0_50] : memref<2x128x256xbf16, #tpu.memory_space<vmem>>, vector<1x128x256xbf16>
    %117 = vector.shape_cast %116 : vector<1x128x256xbf16> to vector<128x256xbf16>
    %118 = arith.truncf %115 : vector<8x128xf32> to vector<8x128xbf16>
    %cst_51 = arith.constant dense<0.000000e+00> : vector<8x256xf32>
    %119 = tpu.matmul %118, %117, %cst_51 {dimension_numbers = #tpu.dot_dimension_numbers<[1], [0], [0], [1], [0, 0, 1, 1], [], []>} : vector<8x128xbf16>, vector<128x256xbf16>, vector<8x256xf32> -> vector<8x256xf32>
    %c0_52 = arith.constant 0 : index
    %c0_53 = arith.constant 0 : index
    %c0_54 = arith.constant 0 : index
    %120 = vector.load %arg12[%c0_52, %c0_53, %c0_54] : memref<2x1x256xf32, #tpu.memory_space<vmem>>, vector<1x1x256xf32>
    %121 = vector.shape_cast %120 : vector<1x1x256xf32> to vector<1x256xf32>
    %122 = vector.broadcast %121 : vector<1x256xf32> to vector<8x256xf32>
    %123 = arith.addf %119, %122 : vector<8x256xf32>
    %124 = arith.mulf %123, %123 : vector<8x256xf32>
    %125 = arith.mulf %123, %124 : vector<8x256xf32>
    %cst_55 = arith.constant 4.471500e-02 : f32
    %126 = vector.broadcast %cst_55 : f32 to vector<8x256xf32>
    %127 = arith.mulf %126, %125 : vector<8x256xf32>
    %128 = arith.addf %123, %127 : vector<8x256xf32>
    %cst_56 = arith.constant 0.797884583 : f32
    %129 = vector.broadcast %cst_56 : f32 to vector<8x256xf32>
    %130 = arith.mulf %129, %128 : vector<8x256xf32>
    %131 = math.tanh %130 : vector<8x256xf32>
    %cst_57 = arith.constant 1.000000e+00 : f32
    %132 = vector.broadcast %cst_57 : f32 to vector<8x256xf32>
    %133 = arith.addf %132, %131 : vector<8x256xf32>
    %cst_58 = arith.constant 5.000000e-01 : f32
    %134 = vector.broadcast %cst_58 : f32 to vector<8x256xf32>
    %135 = arith.mulf %134, %133 : vector<8x256xf32>
    %136 = arith.mulf %123, %135 : vector<8x256xf32>
    %c0_59 = arith.constant 0 : index
    %c0_60 = arith.constant 0 : index
    %c0_61 = arith.constant 0 : index
    %137 = vector.load %arg13[%c0_59, %c0_60, %c0_61] : memref<2x256x128xbf16, #tpu.memory_space<vmem>>, vector<1x256x128xbf16>
    %138 = vector.shape_cast %137 : vector<1x256x128xbf16> to vector<256x128xbf16>
    %139 = arith.truncf %136 : vector<8x256xf32> to vector<8x256xbf16>
    %cst_62 = arith.constant dense<0.000000e+00> : vector<8x128xf32>
    %140 = tpu.matmul %139, %138, %cst_62 {dimension_numbers = #tpu.dot_dimension_numbers<[1], [0], [0], [1], [0, 0, 1, 1], [], []>} : vector<8x256xbf16>, vector<256x128xbf16>, vector<8x128xf32> -> vector<8x128xf32>
    %c0_63 = arith.constant 0 : index
    %c0_64 = arith.constant 0 : index
    %c0_65 = arith.constant 0 : index
    %141 = vector.load %arg14[%c0_63, %c0_64, %c0_65] : memref<2x1x128xf32, #tpu.memory_space<vmem>>, vector<1x1x128xf32>
    %142 = vector.shape_cast %141 : vector<1x1x128xf32> to vector<1x128xf32>
    %143 = vector.broadcast %142 : vector<1x128xf32> to vector<8x128xf32>
    %144 = arith.addf %140, %143 : vector<8x128xf32>
    %145 = arith.addf %115, %144 : vector<8x128xf32>
    %c0_66 = arith.constant 0 : index
    %c0_67 = arith.constant 0 : index
    %c0_68 = arith.constant 0 : index
    %146 = vector.load %arg15[%c0_66, %c0_67, %c0_68] : memref<2x1x128xf32, #tpu.memory_space<vmem>>, vector<1x1x128xf32>
    %147 = vector.shape_cast %146 : vector<1x1x128xf32> to vector<1x128xf32>
    %c0_69 = arith.constant 0 : index
    %c0_70 = arith.constant 0 : index
    %c0_71 = arith.constant 0 : index
    %148 = vector.load %arg16[%c0_69, %c0_70, %c0_71] : memref<2x1x128xf32, #tpu.memory_space<vmem>>, vector<1x1x128xf32>
    %149 = vector.shape_cast %148 : vector<1x1x128xf32> to vector<1x128xf32>
    %cst_72 = arith.constant dense<0.000000e+00> : vector<8xf32>
    %150 = vector.multi_reduction <add>, %145, %cst_72 [1] : vector<8x128xf32> to vector<8xf32>
    %151 = vector.shape_cast %150 : vector<8xf32> to vector<8x1xf32>
    %cst_73 = arith.constant 1.280000e+02 : f32
    %152 = vector.broadcast %cst_73 : f32 to vector<8x1xf32>
    %153 = arith.divf %151, %152 : vector<8x1xf32>
    %154 = vector.broadcast %153 : vector<8x1xf32> to vector<8x128xf32>
    %155 = arith.subf %145, %154 : vector<8x128xf32>
    %156 = arith.mulf %155, %155 : vector<8x128xf32>
    %cst_74 = arith.constant dense<0.000000e+00> : vector<8xf32>
    %157 = vector.multi_reduction <add>, %156, %cst_74 [1] : vector<8x128xf32> to vector<8xf32>
    %158 = vector.shape_cast %157 : vector<8xf32> to vector<8x1xf32>
    %cst_75 = arith.constant 1.280000e+02 : f32
    %159 = vector.broadcast %cst_75 : f32 to vector<8x1xf32>
    %160 = arith.divf %158, %159 : vector<8x1xf32>
    %161 = vector.broadcast %153 : vector<8x1xf32> to vector<8x128xf32>
    %162 = arith.subf %145, %161 : vector<8x128xf32>
    %cst_76 = arith.constant 9.99999996E-13 : f32
    %163 = vector.broadcast %cst_76 : f32 to vector<8x1xf32>
    %164 = arith.addf %160, %163 : vector<8x1xf32>
    %165 = math.rsqrt %164 : vector<8x1xf32>
    %166 = vector.broadcast %165 : vector<8x1xf32> to vector<8x128xf32>
    %167 = arith.mulf %162, %166 : vector<8x128xf32>
    %168 = vector.broadcast %147 : vector<1x128xf32> to vector<8x128xf32>
    %169 = arith.mulf %167, %168 : vector<8x128xf32>
    %170 = vector.broadcast %149 : vector<1x128xf32> to vector<8x128xf32>
    %171 = arith.addf %169, %170 : vector<8x128xf32>
    %c1 = arith.constant 1 : index
    %c0_77 = arith.constant 0 : index
    %c0_78 = arith.constant 0 : index
    %172 = vector.load %arg5[%c1, %c0_77, %c0_78] : memref<2x128x384xbf16, #tpu.memory_space<vmem>>, vector<1x128x384xbf16>
    %173 = vector.shape_cast %172 : vector<1x128x384xbf16> to vector<128x384xbf16>
    %174 = arith.truncf %171 : vector<8x128xf32> to vector<8x128xbf16>
    %cst_79 = arith.constant dense<0.000000e+00> : vector<8x384xf32>
    %175 = tpu.matmul %174, %173, %cst_79 {dimension_numbers = #tpu.dot_dimension_numbers<[1], [0], [0], [1], [0, 0, 1, 1], [], []>} : vector<8x128xbf16>, vector<128x384xbf16>, vector<8x384xf32> -> vector<8x384xf32>
    %c1_80 = arith.constant 1 : index
    %c0_81 = arith.constant 0 : index
    %c0_82 = arith.constant 0 : index
    %176 = vector.load %arg6[%c1_80, %c0_81, %c0_82] : memref<2x1x384xf32, #tpu.memory_space<vmem>>, vector<1x1x384xf32>
    %177 = vector.shape_cast %176 : vector<1x1x384xf32> to vector<1x384xf32>
    %178 = vector.broadcast %177 : vector<1x384xf32> to vector<8x384xf32>
    %179 = arith.addf %175, %178 : vector<8x384xf32>
    %180 = vector.extract_strided_slice %179 {offsets = [0, 0], sizes = [8, 64], strides = [1, 1]} : vector<8x384xf32> to vector<8x64xf32>
    %181 = arith.truncf %180 : vector<8x64xf32> to vector<8x64xbf16>
    %182 = vector.extract_strided_slice %179 {offsets = [0, 128], sizes = [8, 64], strides = [1, 1]} : vector<8x384xf32> to vector<8x64xf32>
    %183 = arith.truncf %182 : vector<8x64xf32> to vector<8x64xbf16>
    %184 = vector.extract_strided_slice %179 {offsets = [0, 256], sizes = [8, 64], strides = [1, 1]} : vector<8x384xf32> to vector<8x64xf32>
    %185 = arith.truncf %184 : vector<8x64xf32> to vector<8x64xbf16>
    %cst_83 = arith.constant dense<0.000000e+00> : vector<8x8xf32>
    %186 = tpu.matmul %181, %183, %cst_83 {dimension_numbers = #tpu.dot_dimension_numbers<[1], [1], [0], [0], [0, 0, 1, 0], [], []>} : vector<8x64xbf16>, vector<8x64xbf16>, vector<8x8xf32> -> vector<8x8xf32>
    %cst_84 = arith.constant 1.250000e-01 : f32
    %187 = vector.broadcast %cst_84 : f32 to vector<8x8xf32>
    %188 = arith.mulf %186, %187 : vector<8x8xf32>
    %189 = vector.broadcast %27 : vector<1x8xf32> to vector<8x8xf32>
    %190 = arith.addf %188, %189 : vector<8x8xf32>
    %cst_85 = arith.constant dense<0xFF800000> : vector<8xf32>
    %191 = vector.multi_reduction <maximumf>, %190, %cst_85 [1] : vector<8x8xf32> to vector<8xf32>
    %192 = vector.shape_cast %191 : vector<8xf32> to vector<8x1xf32>
    %193 = vector.broadcast %192 : vector<8x1xf32> to vector<8x8xf32>
    %194 = arith.subf %190, %193 : vector<8x8xf32>
    %195 = math.exp %194 : vector<8x8xf32>
    %cst_86 = arith.constant dense<0.000000e+00> : vector<8xf32>
    %196 = vector.multi_reduction <add>, %195, %cst_86 [1] : vector<8x8xf32> to vector<8xf32>
    %197 = vector.shape_cast %196 : vector<8xf32> to vector<8x1xf32>
    %198 = vector.broadcast %197 : vector<8x1xf32> to vector<8x8xf32>
    %199 = arith.divf %195, %198 : vector<8x8xf32>
    %200 = arith.truncf %199 : vector<8x8xf32> to vector<8x8xbf16>
    %cst_87 = arith.constant dense<0.000000e+00> : vector<8x64xf32>
    %201 = tpu.matmul %200, %185, %cst_87 {dimension_numbers = #tpu.dot_dimension_numbers<[1], [0], [0], [1], [0, 0, 1, 1], [], []>} : vector<8x8xbf16>, vector<8x64xbf16>, vector<8x64xf32> -> vector<8x64xf32>
    %202 = vector.extract_strided_slice %179 {offsets = [0, 64], sizes = [8, 64], strides = [1, 1]} : vector<8x384xf32> to vector<8x64xf32>
    %203 = arith.truncf %202 : vector<8x64xf32> to vector<8x64xbf16>
    %204 = vector.extract_strided_slice %179 {offsets = [0, 192], sizes = [8, 64], strides = [1, 1]} : vector<8x384xf32> to vector<8x64xf32>
    %205 = arith.truncf %204 : vector<8x64xf32> to vector<8x64xbf16>
    %206 = vector.extract_strided_slice %179 {offsets = [0, 320], sizes = [8, 64], strides = [1, 1]} : vector<8x384xf32> to vector<8x64xf32>
    %207 = arith.truncf %206 : vector<8x64xf32> to vector<8x64xbf16>
    %cst_88 = arith.constant dense<0.000000e+00> : vector<8x8xf32>
    %208 = tpu.matmul %203, %205, %cst_88 {dimension_numbers = #tpu.dot_dimension_numbers<[1], [1], [0], [0], [0, 0, 1, 0], [], []>} : vector<8x64xbf16>, vector<8x64xbf16>, vector<8x8xf32> -> vector<8x8xf32>
    %cst_89 = arith.constant 1.250000e-01 : f32
    %209 = vector.broadcast %cst_89 : f32 to vector<8x8xf32>
    %210 = arith.mulf %208, %209 : vector<8x8xf32>
    %211 = vector.broadcast %27 : vector<1x8xf32> to vector<8x8xf32>
    %212 = arith.addf %210, %211 : vector<8x8xf32>
    %cst_90 = arith.constant dense<0xFF800000> : vector<8xf32>
    %213 = vector.multi_reduction <maximumf>, %212, %cst_90 [1] : vector<8x8xf32> to vector<8xf32>
    %214 = vector.shape_cast %213 : vector<8xf32> to vector<8x1xf32>
    %215 = vector.broadcast %214 : vector<8x1xf32> to vector<8x8xf32>
    %216 = arith.subf %212, %215 : vector<8x8xf32>
    %217 = math.exp %216 : vector<8x8xf32>
    %cst_91 = arith.constant dense<0.000000e+00> : vector<8xf32>
    %218 = vector.multi_reduction <add>, %217, %cst_91 [1] : vector<8x8xf32> to vector<8xf32>
    %219 = vector.shape_cast %218 : vector<8xf32> to vector<8x1xf32>
    %220 = vector.broadcast %219 : vector<8x1xf32> to vector<8x8xf32>
    %221 = arith.divf %217, %220 : vector<8x8xf32>
    %222 = arith.truncf %221 : vector<8x8xf32> to vector<8x8xbf16>
    %cst_92 = arith.constant dense<0.000000e+00> : vector<8x64xf32>
    %223 = tpu.matmul %222, %207, %cst_92 {dimension_numbers = #tpu.dot_dimension_numbers<[1], [0], [0], [1], [0, 0, 1, 1], [], []>} : vector<8x8xbf16>, vector<8x64xbf16>, vector<8x64xf32> -> vector<8x64xf32>
    %224 = tpu.concatenate %201, %223 in 1 : vector<8x64xf32>, vector<8x64xf32> -> vector<8x128xf32>
    %c1_93 = arith.constant 1 : index
    %c0_94 = arith.constant 0 : index
    %c0_95 = arith.constant 0 : index
    %225 = vector.load %arg7[%c1_93, %c0_94, %c0_95] : memref<2x128x128xbf16, #tpu.memory_space<vmem>>, vector<1x128x128xbf16>
    %226 = vector.shape_cast %225 : vector<1x128x128xbf16> to vector<128x128xbf16>
    %227 = arith.truncf %224 : vector<8x128xf32> to vector<8x128xbf16>
    %cst_96 = arith.constant dense<0.000000e+00> : vector<8x128xf32>
    %228 = tpu.matmul %227, %226, %cst_96 {dimension_numbers = #tpu.dot_dimension_numbers<[1], [0], [0], [1], [0, 0, 1, 1], [], []>} : vector<8x128xbf16>, vector<128x128xbf16>, vector<8x128xf32> -> vector<8x128xf32>
    %c1_97 = arith.constant 1 : index
    %c0_98 = arith.constant 0 : index
    %c0_99 = arith.constant 0 : index
    %229 = vector.load %arg8[%c1_97, %c0_98, %c0_99] : memref<2x1x128xf32, #tpu.memory_space<vmem>>, vector<1x1x128xf32>
    %230 = vector.shape_cast %229 : vector<1x1x128xf32> to vector<1x128xf32>
    %231 = vector.broadcast %230 : vector<1x128xf32> to vector<8x128xf32>
    %232 = arith.addf %228, %231 : vector<8x128xf32>
    %233 = arith.addf %171, %232 : vector<8x128xf32>
    %c1_100 = arith.constant 1 : index
    %c0_101 = arith.constant 0 : index
    %c0_102 = arith.constant 0 : index
    %234 = vector.load %arg9[%c1_100, %c0_101, %c0_102] : memref<2x1x128xf32, #tpu.memory_space<vmem>>, vector<1x1x128xf32>
    %235 = vector.shape_cast %234 : vector<1x1x128xf32> to vector<1x128xf32>
    %c1_103 = arith.constant 1 : index
    %c0_104 = arith.constant 0 : index
    %c0_105 = arith.constant 0 : index
    %236 = vector.load %arg10[%c1_103, %c0_104, %c0_105] : memref<2x1x128xf32, #tpu.memory_space<vmem>>, vector<1x1x128xf32>
    %237 = vector.shape_cast %236 : vector<1x1x128xf32> to vector<1x128xf32>
    %cst_106 = arith.constant dense<0.000000e+00> : vector<8xf32>
    %238 = vector.multi_reduction <add>, %233, %cst_106 [1] : vector<8x128xf32> to vector<8xf32>
    %239 = vector.shape_cast %238 : vector<8xf32> to vector<8x1xf32>
    %cst_107 = arith.constant 1.280000e+02 : f32
    %240 = vector.broadcast %cst_107 : f32 to vector<8x1xf32>
    %241 = arith.divf %239, %240 : vector<8x1xf32>
    %242 = vector.broadcast %241 : vector<8x1xf32> to vector<8x128xf32>
    %243 = arith.subf %233, %242 : vector<8x128xf32>
    %244 = arith.mulf %243, %243 : vector<8x128xf32>
    %cst_108 = arith.constant dense<0.000000e+00> : vector<8xf32>
    %245 = vector.multi_reduction <add>, %244, %cst_108 [1] : vector<8x128xf32> to vector<8xf32>
    %246 = vector.shape_cast %245 : vector<8xf32> to vector<8x1xf32>
    %cst_109 = arith.constant 1.280000e+02 : f32
    %247 = vector.broadcast %cst_109 : f32 to vector<8x1xf32>
    %248 = arith.divf %246, %247 : vector<8x1xf32>
    %249 = vector.broadcast %241 : vector<8x1xf32> to vector<8x128xf32>
    %250 = arith.subf %233, %249 : vector<8x128xf32>
    %cst_110 = arith.constant 9.99999996E-13 : f32
    %251 = vector.broadcast %cst_110 : f32 to vector<8x1xf32>
    %252 = arith.addf %248, %251 : vector<8x1xf32>
    %253 = math.rsqrt %252 : vector<8x1xf32>
    %254 = vector.broadcast %253 : vector<8x1xf32> to vector<8x128xf32>
    %255 = arith.mulf %250, %254 : vector<8x128xf32>
    %256 = vector.broadcast %235 : vector<1x128xf32> to vector<8x128xf32>
    %257 = arith.mulf %255, %256 : vector<8x128xf32>
    %258 = vector.broadcast %237 : vector<1x128xf32> to vector<8x128xf32>
    %259 = arith.addf %257, %258 : vector<8x128xf32>
    %c1_111 = arith.constant 1 : index
    %c0_112 = arith.constant 0 : index
    %c0_113 = arith.constant 0 : index
    %260 = vector.load %arg11[%c1_111, %c0_112, %c0_113] : memref<2x128x256xbf16, #tpu.memory_space<vmem>>, vector<1x128x256xbf16>
    %261 = vector.shape_cast %260 : vector<1x128x256xbf16> to vector<128x256xbf16>
    %262 = arith.truncf %259 : vector<8x128xf32> to vector<8x128xbf16>
    %cst_114 = arith.constant dense<0.000000e+00> : vector<8x256xf32>
    %263 = tpu.matmul %262, %261, %cst_114 {dimension_numbers = #tpu.dot_dimension_numbers<[1], [0], [0], [1], [0, 0, 1, 1], [], []>} : vector<8x128xbf16>, vector<128x256xbf16>, vector<8x256xf32> -> vector<8x256xf32>
    %c1_115 = arith.constant 1 : index
    %c0_116 = arith.constant 0 : index
    %c0_117 = arith.constant 0 : index
    %264 = vector.load %arg12[%c1_115, %c0_116, %c0_117] : memref<2x1x256xf32, #tpu.memory_space<vmem>>, vector<1x1x256xf32>
    %265 = vector.shape_cast %264 : vector<1x1x256xf32> to vector<1x256xf32>
    %266 = vector.broadcast %265 : vector<1x256xf32> to vector<8x256xf32>
    %267 = arith.addf %263, %266 : vector<8x256xf32>
    %268 = arith.mulf %267, %267 : vector<8x256xf32>
    %269 = arith.mulf %267, %268 : vector<8x256xf32>
    %cst_118 = arith.constant 4.471500e-02 : f32
    %270 = vector.broadcast %cst_118 : f32 to vector<8x256xf32>
    %271 = arith.mulf %270, %269 : vector<8x256xf32>
    %272 = arith.addf %267, %271 : vector<8x256xf32>
    %cst_119 = arith.constant 0.797884583 : f32
    %273 = vector.broadcast %cst_119 : f32 to vector<8x256xf32>
    %274 = arith.mulf %273, %272 : vector<8x256xf32>
    %275 = math.tanh %274 : vector<8x256xf32>
    %cst_120 = arith.constant 1.000000e+00 : f32
    %276 = vector.broadcast %cst_120 : f32 to vector<8x256xf32>
    %277 = arith.addf %276, %275 : vector<8x256xf32>
    %cst_121 = arith.constant 5.000000e-01 : f32
    %278 = vector.broadcast %cst_121 : f32 to vector<8x256xf32>
    %279 = arith.mulf %278, %277 : vector<8x256xf32>
    %280 = arith.mulf %267, %279 : vector<8x256xf32>
    %c1_122 = arith.constant 1 : index
    %c0_123 = arith.constant 0 : index
    %c0_124 = arith.constant 0 : index
    %281 = vector.load %arg13[%c1_122, %c0_123, %c0_124] : memref<2x256x128xbf16, #tpu.memory_space<vmem>>, vector<1x256x128xbf16>
    %282 = vector.shape_cast %281 : vector<1x256x128xbf16> to vector<256x128xbf16>
    %283 = arith.truncf %280 : vector<8x256xf32> to vector<8x256xbf16>
    %cst_125 = arith.constant dense<0.000000e+00> : vector<8x128xf32>
    %284 = tpu.matmul %283, %282, %cst_125 {dimension_numbers = #tpu.dot_dimension_numbers<[1], [0], [0], [1], [0, 0, 1, 1], [], []>} : vector<8x256xbf16>, vector<256x128xbf16>, vector<8x128xf32> -> vector<8x128xf32>
    %c1_126 = arith.constant 1 : index
    %c0_127 = arith.constant 0 : index
    %c0_128 = arith.constant 0 : index
    %285 = vector.load %arg14[%c1_126, %c0_127, %c0_128] : memref<2x1x128xf32, #tpu.memory_space<vmem>>, vector<1x1x128xf32>
    %286 = vector.shape_cast %285 : vector<1x1x128xf32> to vector<1x128xf32>
    %287 = vector.broadcast %286 : vector<1x128xf32> to vector<8x128xf32>
    %288 = arith.addf %284, %287 : vector<8x128xf32>
    %289 = arith.addf %259, %288 : vector<8x128xf32>
    %c1_129 = arith.constant 1 : index
    %c0_130 = arith.constant 0 : index
    %c0_131 = arith.constant 0 : index
    %290 = vector.load %arg15[%c1_129, %c0_130, %c0_131] : memref<2x1x128xf32, #tpu.memory_space<vmem>>, vector<1x1x128xf32>
    %291 = vector.shape_cast %290 : vector<1x1x128xf32> to vector<1x128xf32>
    %c1_132 = arith.constant 1 : index
    %c0_133 = arith.constant 0 : index
    %c0_134 = arith.constant 0 : index
    %292 = vector.load %arg16[%c1_132, %c0_133, %c0_134] : memref<2x1x128xf32, #tpu.memory_space<vmem>>, vector<1x1x128xf32>
    %293 = vector.shape_cast %292 : vector<1x1x128xf32> to vector<1x128xf32>
    %cst_135 = arith.constant dense<0.000000e+00> : vector<8xf32>
    %294 = vector.multi_reduction <add>, %289, %cst_135 [1] : vector<8x128xf32> to vector<8xf32>
    %295 = vector.shape_cast %294 : vector<8xf32> to vector<8x1xf32>
    %cst_136 = arith.constant 1.280000e+02 : f32
    %296 = vector.broadcast %cst_136 : f32 to vector<8x1xf32>
    %297 = arith.divf %295, %296 : vector<8x1xf32>
    %298 = vector.broadcast %297 : vector<8x1xf32> to vector<8x128xf32>
    %299 = arith.subf %289, %298 : vector<8x128xf32>
    %300 = arith.mulf %299, %299 : vector<8x128xf32>
    %cst_137 = arith.constant dense<0.000000e+00> : vector<8xf32>
    %301 = vector.multi_reduction <add>, %300, %cst_137 [1] : vector<8x128xf32> to vector<8xf32>
    %302 = vector.shape_cast %301 : vector<8xf32> to vector<8x1xf32>
    %cst_138 = arith.constant 1.280000e+02 : f32
    %303 = vector.broadcast %cst_138 : f32 to vector<8x1xf32>
    %304 = arith.divf %302, %303 : vector<8x1xf32>
    %305 = vector.broadcast %297 : vector<8x1xf32> to vector<8x128xf32>
    %306 = arith.subf %289, %305 : vector<8x128xf32>
    %cst_139 = arith.constant 9.99999996E-13 : f32
    %307 = vector.broadcast %cst_139 : f32 to vector<8x1xf32>
    %308 = arith.addf %304, %307 : vector<8x1xf32>
    %309 = math.rsqrt %308 : vector<8x1xf32>
    %310 = vector.broadcast %309 : vector<8x1xf32> to vector<8x128xf32>
    %311 = arith.mulf %306, %310 : vector<8x128xf32>
    %312 = vector.broadcast %291 : vector<1x128xf32> to vector<8x128xf32>
    %313 = arith.mulf %311, %312 : vector<8x128xf32>
    %314 = vector.broadcast %293 : vector<1x128xf32> to vector<8x128xf32>
    %315 = arith.addf %313, %314 : vector<8x128xf32>
    %316 = vector.extract_strided_slice %315 {offsets = [0, 0], sizes = [1, 128], strides = [1, 1]} : vector<8x128xf32> to vector<1x128xf32>
    %c0_140 = arith.constant 0 : index
    %c0_141 = arith.constant 0 : index
    %317 = vector.load %arg17[%c0_140, %c0_141] : memref<128x128xbf16, #tpu.memory_space<vmem>>, vector<128x128xbf16>
    %318 = arith.truncf %316 : vector<1x128xf32> to vector<1x128xbf16>
    %cst_142 = arith.constant dense<0.000000e+00> : vector<1x128xf32>
    %319 = tpu.matmul %318, %317, %cst_142 {dimension_numbers = #tpu.dot_dimension_numbers<[1], [0], [0], [1], [0, 0, 1, 1], [], []>} : vector<1x128xbf16>, vector<128x128xbf16>, vector<1x128xf32> -> vector<1x128xf32>
    %c0_143 = arith.constant 0 : index
    %c0_144 = arith.constant 0 : index
    %320 = vector.load %arg18[%c0_143, %c0_144] : memref<1x128xf32, #tpu.memory_space<vmem>>, vector<1x128xf32>
    %321 = arith.addf %319, %320 : vector<1x128xf32>
    %cst_145 = arith.constant 0.000000e+00 : f32
    %322 = vector.broadcast %cst_145 : f32 to vector<1x128xf32>
    %323 = arith.maximumf %321, %322 : vector<1x128xf32>
    %c0_146 = arith.constant 0 : index
    %c0_147 = arith.constant 0 : index
    %324 = vector.load %arg19[%c0_146, %c0_147] : memref<128x128xbf16, #tpu.memory_space<vmem>>, vector<128x128xbf16>
    %325 = arith.truncf %323 : vector<1x128xf32> to vector<1x128xbf16>
    %cst_148 = arith.constant dense<0.000000e+00> : vector<1x128xf32>
    %326 = tpu.matmul %325, %324, %cst_148 {dimension_numbers = #tpu.dot_dimension_numbers<[1], [0], [0], [1], [0, 0, 1, 1], [], []>} : vector<1x128xbf16>, vector<128x128xbf16>, vector<1x128xf32> -> vector<1x128xf32>
    %c0_149 = arith.constant 0 : index
    %c0_150 = arith.constant 0 : index
    %327 = vector.load %arg20[%c0_149, %c0_150] : memref<1x128xf32, #tpu.memory_space<vmem>>, vector<1x128xf32>
    %328 = arith.addf %326, %327 : vector<1x128xf32>
    %c0_151 = arith.constant 0 : index
    %c0_152 = arith.constant 0 : index
    %c0_153 = arith.constant 0 : index
    %329 = vector.load %arg21[%c0_151, %c0_152, %c0_153] : memref<1x1x128xf32, #tpu.memory_space<vmem>>, vector<1x1x128xf32>
    %330 = vector.shape_cast %329 : vector<1x1x128xf32> to vector<1x128xf32>
    %331 = vector.shape_cast %328 : vector<1x128xf32> to vector<1x1x128xf32>
    tpu.vector_store %arg21[%c0_151, %c0_152, %c0_153], %331 {strides = array<i32>} : memref<1x1x128xf32, #tpu.memory_space<vmem>>, vector<1x1x128xf32>,
    return
  }
  func.func @transform_0(%arg0: i32) -> (i32, i32, i32) {
    %c0_i32 = arith.constant 0 : i32
    %c0_i32_0 = arith.constant 0 : i32
    %c0_i32_1 = arith.constant 0 : i32
    return %arg0, %c0_i32, %c0_i32_0 : i32, i32, i32
  }
  func.func @transform_1(%arg0: i32) -> (i32, i32, i32) {
    %c0_i32 = arith.constant 0 : i32
    %c0_i32_0 = arith.constant 0 : i32
    %c0_i32_1 = arith.constant 0 : i32
    return %arg0, %c0_i32, %c0_i32_0 : i32, i32, i32
  }
  func.func @transform_2(%arg0: i32) -> (i32, i32) {
    %c0_i32 = arith.constant 0 : i32
    %c0_i32_0 = arith.constant 0 : i32
    %c0_i32_1 = arith.constant 0 : i32
    return %c0_i32, %c0_i32_0 : i32, i32
  }
  func.func @transform_3(%arg0: i32) -> (i32, i32) {
    %c0_i32 = arith.constant 0 : i32
    %c0_i32_0 = arith.constant 0 : i32
    %c0_i32_1 = arith.constant 0 : i32
    return %c0_i32, %c0_i32_0 : i32, i32
  }
  func.func @transform_4(%arg0: i32) -> (i32, i32, i32) {
    %c0_i32 = arith.constant 0 : i32
    %c0_i32_0 = arith.constant 0 : i32
    %c0_i32_1 = arith.constant 0 : i32
    %c0_i32_2 = arith.constant 0 : i32
    return %c0_i32, %c0_i32_0, %c0_i32_1 : i32, i32, i32
  }
  func.func @transform_5(%arg0: i32) -> (i32, i32, i32) {
    %c0_i32 = arith.constant 0 : i32
    %c0_i32_0 = arith.constant 0 : i32
    %c0_i32_1 = arith.constant 0 : i32
    %c0_i32_2 = arith.constant 0 : i32
    return %c0_i32, %c0_i32_0, %c0_i32_1 : i32, i32, i32
  }
  func.func @transform_6(%arg0: i32) -> (i32, i32, i32) {
    %c0_i32 = arith.constant 0 : i32
    %c0_i32_0 = arith.constant 0 : i32
    %c0_i32_1 = arith.constant 0 : i32
    %c0_i32_2 = arith.constant 0 : i32
    return %c0_i32, %c0_i32_0, %c0_i32_1 : i32, i32, i32
  }
  func.func @transform_7(%arg0: i32) -> (i32, i32, i32) {
    %c0_i32 = arith.constant 0 : i32
    %c0_i32_0 = arith.constant 0 : i32
    %c0_i32_1 = arith.constant 0 : i32
    %c0_i32_2 = arith.constant 0 : i32
    return %c0_i32, %c0_i32_0, %c0_i32_1 : i32, i32, i32
  }
  func.func @transform_8(%arg0: i32) -> (i32, i32, i32) {
    %c0_i32 = arith.constant 0 : i32
    %c0_i32_0 = arith.constant 0 : i32
    %c0_i32_1 = arith.constant 0 : i32
    %c0_i32_2 = arith.constant 0 : i32
    return %c0_i32, %c0_i32_0, %c0_i32_1 : i32, i32, i32
  }
  func.func @transform_9(%arg0: i32) -> (i32, i32, i32) {
    %c0_i32 = arith.constant 0 : i32
    %c0_i32_0 = arith.constant 0 : i32
    %c0_i32_1 = arith.constant 0 : i32
    %c0_i32_2 = arith.constant 0 : i32
    return %c0_i32, %c0_i32_0, %c0_i32_1 : i32, i32, i32
  }
  func.func @transform_10(%arg0: i32) -> (i32, i32, i32) {
    %c0_i32 = arith.constant 0 : i32
    %c0_i32_0 = arith.constant 0 : i32
    %c0_i32_1 = arith.constant 0 : i32
    %c0_i32_2 = arith.constant 0 : i32
    return %c0_i32, %c0_i32_0, %c0_i32_1 : i32, i32, i32
  }
  func.func @transform_11(%arg0: i32) -> (i32, i32, i32) {
    %c0_i32 = arith.constant 0 : i32
    %c0_i32_0 = arith.constant 0 : i32
    %c0_i32_1 = arith.constant 0 : i32
    %c0_i32_2 = arith.constant 0 : i32
    return %c0_i32, %c0_i32_0, %c0_i32_1 : i32, i32, i32
  }
  func.func @transform_12(%arg0: i32) -> (i32, i32, i32) {
    %c0_i32 = arith.constant 0 : i32
    %c0_i32_0 = arith.constant 0 : i32
    %c0_i32_1 = arith.constant 0 : i32
    %c0_i32_2 = arith.constant 0 : i32
    return %c0_i32, %c0_i32_0, %c0_i32_1 : i32, i32, i32
  }
  func.func @transform_13(%arg0: i32) -> (i32, i32, i32) {
    %c0_i32 = arith.constant 0 : i32
    %c0_i32_0 = arith.constant 0 : i32
    %c0_i32_1 = arith.constant 0 : i32
    %c0_i32_2 = arith.constant 0 : i32
    return %c0_i32, %c0_i32_0, %c0_i32_1 : i32, i32, i32
  }
  func.func @transform_14(%arg0: i32) -> (i32, i32, i32) {
    %c0_i32 = arith.constant 0 : i32
    %c0_i32_0 = arith.constant 0 : i32
    %c0_i32_1 = arith.constant 0 : i32
    %c0_i32_2 = arith.constant 0 : i32
    return %c0_i32, %c0_i32_0, %c0_i32_1 : i32, i32, i32
  }
  func.func @transform_15(%arg0: i32) -> (i32, i32, i32) {
    %c0_i32 = arith.constant 0 : i32
    %c0_i32_0 = arith.constant 0 : i32
    %c0_i32_1 = arith.constant 0 : i32
    %c0_i32_2 = arith.constant 0 : i32
    return %c0_i32, %c0_i32_0, %c0_i32_1 : i32, i32, i32
  }
  func.func @transform_16(%arg0: i32) -> (i32, i32) {
    %c0_i32 = arith.constant 0 : i32
    %c0_i32_0 = arith.constant 0 : i32
    %c0_i32_1 = arith.constant 0 : i32
    return %c0_i32, %c0_i32_0 : i32, i32
  }
  func.func @transform_17(%arg0: i32) -> (i32, i32) {
    %c0_i32 = arith.constant 0 : i32
    %c0_i32_0 = arith.constant 0 : i32
    %c0_i32_1 = arith.constant 0 : i32
    return %c0_i32, %c0_i32_0 : i32, i32
  }
  func.func @transform_18(%arg0: i32) -> (i32, i32) {
    %c0_i32 = arith.constant 0 : i32
    %c0_i32_0 = arith.constant 0 : i32
    %c0_i32_1 = arith.constant 0 : i32
    return %c0_i32, %c0_i32_0 : i32, i32
  }
  func.func @transform_19(%arg0: i32) -> (i32, i32) {
    %c0_i32 = arith.constant 0 : i32
    %c0_i32_0 = arith.constant 0 : i32
    %c0_i32_1 = arith.constant 0 : i32
    return %c0_i32, %c0_i32_0 : i32, i32
  }
  func.func @transform_20(%arg0: i32) -> (i32, i32, i32) {
    %c0_i32 = arith.constant 0 : i32
    %c0_i32_0 = arith.constant 0 : i32
    %c0_i32_1 = arith.constant 0 : i32
    return %arg0, %c0_i32, %c0_i32_0 : i32, i32, i32
  }
}

</mosaic_0001>

<bundles_post_ra>
// kernel: spam_classifier_forward.1
= control target key start
LH: loop header
LB: loop body
LE: loop exit
PB: predicated region body
PF: predicated region fallthrough
CT: control target
= control target key end

     0   :  { %s4429_s0 = inlined_call_operand.vmem [shape: f32[2,8,128], index: 0, kind: input, shape index: {}]   ;;  %s4430_s1 = inlined_call_operand.vmem [shape: f32[2,1,8], index: 1, kind: input, shape index: {}]   ;;  %s4431_s2 = inlined_call_operand.vmem [shape: f32[1,128], index: 2, kind: input, shape index: {}]   ;;  %s4432_s3 = inlined_call_operand.vmem [shape: f32[1,128], index: 3, kind: input, shape index: {}]   ;;  %s4433_s4 = inlined_call_operand.hbm [shape: bf16[2,128,384], index: 4, kind: input, shape index: {}]   ;;  %s4434_s5 = inlined_call_operand.vmem [shape: f32[2,1,384], index: 5, kind: input, shape index: {}]   ;;  %s4435_s6 = inlined_call_operand.hbm [shape: bf16[2,128,128], index: 6, kind: input, shape index: {}]   ;;  %s4436_s7 = inlined_call_operand.vmem [shape: f32[2,1,128], index: 7, kind: input, shape index: {}]   ;;  %s4437_s8 = inlined_call_operand.vmem [shape: f32[2,1,128], index: 8, kind: input, shape index: {}]   ;;  %s4438_s9 = inlined_call_operand.vmem [shape: f32[2,1,128], index: 9, kind: input, shape index: {}]   ;;  %s4439_s10 = inlined_call_operand.vmem [shape: bf16[2,128,256], index: 10, kind: input, shape index: {}]   ;;  %s4440_s11 = inlined_call_operand.vmem [shape: f32[2,1,256], index: 11, kind: input, shape index: {}]   ;;  %s4441_s12 = inlined_call_operand.hbm [shape: bf16[2,256,128], index: 12, kind: input, shape index: {}]   ;;  %s4442_s13 = inlined_call_operand.vmem [shape: f32[2,1,128], index: 13, kind: input, shape index: {}]   ;;  %s4443_s14 = inlined_call_operand.vmem [shape: f32[2,1,128], index: 14, kind: input, shape index: {}]   ;;  %s4444_s15 = inlined_call_operand.vmem [shape: f32[2,1,128], index: 15, kind: input, shape index: {}]   ;;  %s4445_s16 = inlined_call_operand.hbm [shape: bf16[128,128], index: 16, kind: input, shape index: {}]   ;;  %s4446_s17 = inlined_call_operand.vmem [shape: f32[1,128], index: 17, kind: input, shape index: {}]   ;;  %s4447_s18 = inlined_call_operand.hbm [shape: bf16[128,128], index: 18, kind: input, shape index: {}]   ;;  %s4448_s19 = inlined_call_operand.vmem [shape: f32[1,128], index: 19, kind: input, shape index: {}]   ;;  %s4449_s20 = inlined_call_operand.hbm [shape: f32[2,1,128], index: 20, kind: output, shape index: {}]  }
   0x1   :  { %4461 = sst [smem:[#allocation24_spill]] %s4429_s0 }
   0x2   :  { %4462 = sst [smem:[#allocation25_spill]] %s4430_s1 }
   0x3   :  { %4463 = sst [smem:[#allocation26_spill]] %s4431_s2 }
   0x4   :  { %4464 = sst [smem:[#allocation27_spill]] %s4432_s3 }
   0x5   :  { %4465 = sst [smem:[#allocation28_spill]] %s4433_s4 }
   0x6   :  { %4466 = sst [smem:[#allocation29_spill]] %s4435_s6 }
   0x7   :  { %4467 = sst [smem:[#allocation30_spill]] %s4445_s16 }
   0x8   :  { %4468 = sst [smem:[#allocation31_spill]] %s4446_s17 }
   0x9   :  { %4469 = sst [smem:[#allocation32_spill]] %s4448_s19 }
   0xa   :  { %4470 = sst [smem:[#allocation33_spill]] %s4449_s20 }
   0xb   :  { %25 = vsyncpa [#allocation3], 0 }
   0xc   :  { %26 = vsyncpa [#allocation6], 0 }
   0xd   :  { %27 = vsyncpa [#allocation9], 0 }
   0xe   :  { %28 = vsyncpa [#allocation4], 0 }
   0xf   :  { %30 = vsyncpa [#allocation4 + $0x1], 0  ;;  %s3936_s1 = smov 0   ;;  %s3938_s22 = smov 0  }
  0x10   :  { %s3940_s23 = smov 0   ;;  %s3942_s24 = smov 0  }
  0x11 LB: > { %4471 = sst [smem:[#allocation16_spill]] %s3806_s1  ;;  %s3957_s2 = sadd.s32 4294967295, %s3818_s24   ;;  %s3818_s24 = sphi %s3942_s24, %s4498_s24   ;;  %s3814_s23 = sphi %s3940_s23, %s4501_s23   ;;  %s3810_s22 = sphi %s3938_s22, %s4500_s22   ;;  %s3806_s1 = sphi %s3936_s1, %s4499_s1  }
  0x12   : > { %4472 = sst [smem:[#allocation17_spill]] %s3810_s22  ;;  %s2678_s25 = sadd.s32 4294967294, %s3818_s24  }
  0x13   : > { %4473 = sst [smem:[#allocation18_spill]] %s3814_s23  ;;  %s3961_s3 = sadd.s32 1, %s3818_s24  }
  0x14   : > { %4474 = sst [smem:[#allocation19_spill]] %s3818_s24  ;;  %s473_s26 = sadd.s32 1, %s3814_s23 }
  0x15   : > { %4475 = sst [smem:[#allocation20_spill]] %s3961_s3  ;;  %s470_s27 = ssub.s32 %s3818_s24, %s3961_s3 }
  0x16   : > { %p483_p0 = scmp.ne.s32.totalorder %s3814_s23, %s3810_s22  ;;  %p471_p1 = scmp.eq.s32.totalorder %s470_s27, 0 }
  0x17   : > { %p484_p2 = scmp.eq.s32.totalorder %s3957_s2, 1  ;;  %p489_p3 = scmp.ne.s32.totalorder %s3810_s22, %s3806_s1 }
  0x18   : > { %p490_p4 = scmp.eq.s32.totalorder %s2678_s25, 1  ;;  %p2679_p7 = scmp.ge.s32.totalorder %s3818_s24, 1 }
  0x19   : > { %s3972_s28 = scalar_select %p471_p1, %s3814_s23, %s473_s26  }
  0x1a   : > { %p3974_p5 = por %p484_p2, %p483_p0  ;;  %p3978_p6 = por %p490_p4, %p489_p3 }
  0x1b   : > { %4476 = sst [smem:[#allocation21_spill]] %s3972_s28  ;;  %p497_p8 = scmp.lt.s32.totalorder %s3818_s24, 3 }
  0x1c   : > { %s4477_s4 = scalar_select %p3974_p5, 1, 0 }
  0x1d   : > { %s4479_s29 = scalar_select %p3978_p6, 1, 0 }
  0x1e   : > { %4478 = sst [smem:[#allocation22_spill]] %s4477_s4  ;;  %p3489_p9 = scmp.eq.s32.totalorder %s3957_s2, 0 }
  0x1f   : > { %4480 = sst [smem:[#allocation23_spill]] %s4479_s29  ;;  %p3985_p10 = pnand %p2679_p7, %p497_p8 }
  0x20   : > { %s4482_s6 = sld [smem:[#allocation29_spill]]  ;;  %s3820_s26 = smov [#allocation5]  }
  0x21   : > { %p3469_p11 = pneg %p3985_p10  ;;  %s533_s27 = sshll.u32 %s3820_s26, 4  ;;  %s534_s27 = int_to_ptr.vmem [resolvable:$true] %s533_s27 }
  0x22   : > { %s4484_s16 = sld [smem:[#allocation30_spill]]  ;;  %s3821_s0 = smov 64  }
  0x23   : > { %p3996_p12 = pnand %p3489_p9, %p3469_p11  ;;  %s3822_s21 = smov 4  }
  0x24   : > { %s4485_s19 = sld [smem:[#allocation28_spill]]  ;;  %s3824_s23 = smov [#allocation2]  }
  0x25   : > { %s516_s3 = sshll.u32 %s3824_s23, 4  ;;  %s560_s17 = sshll.u32 %s4441_s12, 4  ;;  %s517_s3 = int_to_ptr.vmem [resolvable:$true] %s516_s3  ;;  %s561_s17 = int_to_ptr.hbm [resolvable:$true] %s560_s17 }
  0x26   : > { %s531_s25 = sshll.u32 %s4482_s6, 4  ;;  %s3823_s6 = smov [#allocation8]   ;;  %s532_s25 = int_to_ptr.hbm [resolvable:$true] %s531_s25 }
  0x27   : > { %3475 = dma.hbm_to_vmem [thread:$0]  (!%p3996_p12), %s532_s25, 2048, %s534_s27, [#allocation6], %s3821_s0, %s3821_s0, %s3822_s21  }
  0x28   : > { %s583_s29 = sshll.u32 %s4484_s16, 4  ;;  %s585_s26 = sshll.u32 %s3823_s6, 4  ;;  %s584_s29 = int_to_ptr.hbm [resolvable:$true] %s583_s29  ;;  %s586_s26 = int_to_ptr.vmem [resolvable:$true] %s585_s26 }
  0x29   : > { %3481 = dma.hbm_to_vmem [thread:$0]  (!%p3996_p12), %s584_s29, 1024, %s586_s26, [#allocation9], %s3821_s0, %s3821_s0, %s3822_s21  }
  0x2a   : > { %s514_s4 = sshll.u32 %s4485_s19, 4  ;;  %s3825_s25 = smov 192   ;;  %s515_s4 = int_to_ptr.hbm [resolvable:$true] %s514_s4 }
  0x2b   : > { %s3826_s27 = smov 12   ;;  %s3827_s6 = smov [#allocation7]  }
  0x2c   : > { %3472 = dma.hbm_to_vmem [thread:$0]  (!%p3996_p12), %s515_s4, 6144, %s517_s3, [#allocation3], %s3825_s25, %s3825_s25, %s3826_s27  }
  0x2d   : > { %s562_s19 = sshll.u32 %s3827_s6, 4  ;;  %s600_s22 = sshll.u32 %s4447_s18, 4  ;;  %s563_s19 = int_to_ptr.vmem [resolvable:$true] %s562_s19  ;;  %s601_s22 = int_to_ptr.hbm [resolvable:$true] %s600_s22 }
  0x2e   : > { %3478 = dma.hbm_to_vmem [thread:$0]  (!%p3996_p12), %s561_s17, 4096, %s563_s19, [#allocation6], %s3821_s0, %s3821_s0, %s3822_s21  }
  0x2f   : > { %s3828_s29 = smov [#allocation10]   ;;  %634 = sbr.rel (%p3985_p10) target bundleno = 4603 (0x11fb), region = 100 }
  0x30   : > { %s602_s26 = sshll.u32 %s3828_s29, 4  ;;  %s603_s26 = int_to_ptr.vmem [resolvable:$true] %s602_s26 }
  0x31   : > { %3484 = dma.hbm_to_vmem [thread:$0]  (!%p3996_p12), %s601_s22, 1024, %s603_s26, [#allocation9], %s3821_s0, %s3821_s0, %s3822_s21  }
  0x34   : > { %3789 = dma.done.wait (%p3489_p9), [#allocation3], 6144  }
  0x35   : > { %3791 = vsyncadd (%p3489_p9), [#allocation3], 4294961152 }
  0x36   : > { %3793 = dma.done.wait (%p3489_p9), [#allocation6], 6144  }
  0x37   : > { %3795 = vsyncadd (%p3489_p9), [#allocation6], 4294961152 }
  0x38   : > { %3797 = dma.done.wait (%p3489_p9), [#allocation9], 2048  }
  0x39   : > { %3799 = vsyncadd (%p3489_p9), [#allocation9], 4294965248  ;;  %p714_p13 = scmp.lt.s32.totalorder %s3957_s2, 1  ;;  %s4486_s28 = sld [smem:[#allocation24_spill]]  ;;  %v3829_v1 = vmov 128.0   ;;  %vm972_vm4 = vcmask 523264  }
  0x3a   : > { %s4487_s21 = sld [smem:[#allocation25_spill]]  ;;  %3558 = vrcp.f32 %v3829_v1  ;;  %v2779_v2 = vld [vmem:[#allocation2 + $0xa8] sm:$0xf]  ;;  %v3325_v3 = vld [vmem:[#allocation2 + $0xb0] sm:$0xf0]  ;;  %s3830_s26 = smov 64  }
  0x3b   : > { %s4038_s16 = scalar_select %p714_p13, %s3957_s2, 1  ;;  %v3324_v4 = vld [vmem:[#allocation2 + $0xac] sm:$0xf]  ;;  %v2780_v5 = vor.u32 %v3325_v3, %v2779_v2  ;;  %v2781_v6 = vld [vmem:[#allocation2 + $0xb4] sm:$0xf0]  ;;  %vm1026_vm5 = vcmask 1043456  }
  0x3c   : > { %v2787_v7 = vld [vmem:[#allocation2 + $0xb0] sm:$0xf]  ;;  %v3326_v8 = vld [vmem:[#allocation2 + $0xb8] sm:$0xf0]  ;;  %v2784_v9 = vor.u32 %v3324_v4, %v2781_v6  ;;  %v3321_v23 = vld [vmem:[#allocation2 + $0x94] sm:$0xf] }
  0x3d   : > { %s2692_s17 = sshll.u32 %s4038_s16, 3  ;;  %v2788_v10 = vor.u32 %v3326_v8, %v2787_v7  ;;  %930 = vmatpush.bf16.msra.mxu0 %v2780_v5  ;;  %v2767_v21 = vld [vmem:[#allocation2 + $0x90] sm:$0xf]  ;;  %v3322_v22 = vld [vmem:[#allocation2 + $0x98] sm:$0xf0]  ;;  %s4488_s27 = sld [smem:[#allocation26_spill]] }
  0x3e   : > { %943 = vmatpush.bf16.msra.mxu1 %v2784_v9  ;;  %v2768_v24 = vor.u32 %v3322_v22, %v2767_v21  ;;  %v2769_v25 = vld [vmem:[#allocation2 + $0x9c] sm:$0xf0]  ;;  %v2775_v26 = vld [vmem:[#allocation2 + $0x98] sm:$0xf]  ;;  %v3323_v27 = vld [vmem:[#allocation2 + $0xa0] sm:$0xf0] }
  0x3f   : > { %s717_s4 = scalar_lea.vmem %s4486_s28, %s2692_s17  ;;  %956 = vmatpush.bf16.msra.mxu2 %v2788_v10  ;;  %v2772_v28 = vor.u32 %v3321_v23, %v2769_v25  ;;  %v2776_v29 = vor.u32 %v3323_v27, %v2775_v26  ;;  %v2755_v30 = vld [vmem:[#allocation2 + $0x78] sm:$0xf]  ;;  %v3319_v31 = vld [vmem:[#allocation2 + $0x80] sm:$0xf0]  ;;  %v3318_v32 = vld [vmem:[#allocation2 + $0x7c] sm:$0xf] }
  0x40   : > { %s720_s23 = scalar_lea.vmem %s4487_s21, %s4038_s16  ;;  %v722_v0 = vld [vmem:[%s717_s4] sm:$0xff]  ;;  %v3559_v11 = vpop.eup %3558  ;;  %v2756_v33 = vor.u32 %v3319_v31, %v2755_v30  ;;  %v2757_v34 = vld [vmem:[#allocation2 + $0x84] sm:$0xf0]  ;;  %v3320_v36 = vld [vmem:[#allocation2 + $0x88] sm:$0xf0]  ;;  %s4489_s1 = sld [smem:[#allocation27_spill]] }
  0x41   : > { %725 = vadd.xlane.f32.xlu0 %v722_v0  ;;  %v728_v12 = vmul.f32 128.0, %v3559_v11  ;;  %vm732_vm0 = vweird.f32 %v3559_v11  ;;  %931 = vmatpush.bf16.msra.mxu0 %v2768_v24  ;;  %v2763_v35 = vld [vmem:[#allocation2 + $0x80] sm:$0xf]  ;;  %v2760_v37 = vor.u32 %v3318_v32, %v2757_v34  ;;  %v3316_v40 = vld [vmem:[#allocation2 + $0x68] sm:$0xf0]  ;;  %vm997_vm6 = vcmask 64512  }
  0x42   : > { %944 = vmatpush.bf16.msra.mxu1 %v2772_v28  ;;  %v2764_v38 = vor.u32 %v3320_v36, %v2763_v35  ;;  %v2743_v39 = vld [vmem:[#allocation2 + $0x60] sm:$0xf]  ;;  %v3315_v41 = vld [vmem:[#allocation2 + $0x64] sm:$0xf]  ;;  %v2745_v43 = vld [vmem:[#allocation2 + $0x6c] sm:$0xf0] }
  0x43   : > { %v729_v13 = vsub.f32 1.0, %v728_v12  ;;  %957 = vmatpush.bf16.msra.mxu2 %v2776_v29  ;;  %v2744_v42 = vor.u32 %v3316_v40, %v2743_v39  ;;  %v2751_v44 = vld [vmem:[#allocation2 + $0x68] sm:$0xf]  ;;  %v3317_v45 = vld [vmem:[#allocation2 + $0x70] sm:$0xf0]  ;;  %v2748_v46 = vor.u32 %v3315_v41, %v2745_v43  ;;  %s4490_s16 = sld [smem:[#allocation17_spill]] }
  0x44   : > { %v2752_v47 = vor.u32 %v3317_v45, %v2751_v44  ;;  %v2731_v48 = vld [vmem:[#allocation2 + $0x48] sm:$0xf]  ;;  %v3313_v49 = vld [vmem:[#allocation2 + $0x50] sm:$0xf0]  ;;  %v3312_v50 = vld [vmem:[#allocation2 + $0x4c] sm:$0xf] }
  0x45   : > { %v730_v14 = vmul.f32 %v3559_v11, %v729_v13  ;;  %932 = vmatpush.bf16.msra.mxu0 %v2756_v33  ;;  %v2732_v51 = vor.u32 %v3313_v49, %v2731_v48  ;;  %v2733_v52 = vld [vmem:[#allocation2 + $0x54] sm:$0xf0]  ;;  %v2739_v53 = vld [vmem:[#allocation2 + $0x50] sm:$0xf]  ;;  %v3314_v54 = vld [vmem:[#allocation2 + $0x58] sm:$0xf0] }
  0x46   : > { %945 = vmatpush.bf16.msra.mxu1 %v2760_v37  ;;  %v2736_v55 = vor.u32 %v3312_v50, %v2733_v52  ;;  %v2740_v56 = vor.u32 %v3314_v54, %v2739_v53  ;;  %v2719_v57 = vld [vmem:[#allocation2 + $0x30] sm:$0xf]  ;;  %v3310_v58 = vld [vmem:[#allocation2 + $0x38] sm:$0xf0]  ;;  %v3309_v59 = vld [vmem:[#allocation2 + $0x34] sm:$0xf] }
  0x47   : > { %v731_v15 = vadd.f32 %v3559_v11, %v730_v14  ;;  %958 = vmatpush.bf16.msra.mxu2 %v2764_v38  ;;  %v2720_v60 = vor.u32 %v3310_v58, %v2719_v57  ;;  %v2721_v61 = vld [vmem:[#allocation2 + $0x3c] sm:$0xf0]  ;;  %v2727_v62 = vld [vmem:[#allocation2 + $0x38] sm:$0xf]  ;;  %v3311_v63 = vld [vmem:[#allocation2 + $0x40] sm:$0xf0] }
  0x48   : > { %v2728_v1 = vor.u32 %v3311_v63, %v2727_v62  ;;  %v2707_v2 = vld [vmem:[#allocation2 + $0x18] sm:$0xf]  ;;  %v3307_v3 = vld [vmem:[#allocation2 + $0x20] sm:$0xf0]  ;;  %v3306_v4 = vld [vmem:[#allocation2 + $0x1c] sm:$0xf] }
  0x49   : > { %v4048_v16 = vsel %vm732_vm0, %v3559_v11, %v731_v15  ;;  %933 = vmatpush.bf16.msra.mxu0 %v2744_v42  ;;  %v2708_v5 = vor.u32 %v3307_v3, %v2707_v2  ;;  %v2709_v6 = vld [vmem:[#allocation2 + $0x24] sm:$0xf0]  ;;  %v2715_v7 = vld [vmem:[#allocation2 + $0x20] sm:$0xf]  ;;  %v3308_v8 = vld [vmem:[#allocation2 + $0x28] sm:$0xf0] }
  0x4a   : > { %946 = vmatpush.bf16.msra.mxu1 %v2748_v46  ;;  %v2712_v9 = vor.u32 %v3306_v4, %v2709_v6  ;;  %v2716_v10 = vor.u32 %v3308_v8, %v2715_v7  ;;  %v2695_v11 = vld [vmem:[#allocation2] sm:$0xf]  ;;  %v3304_v12 = vld [vmem:[#allocation2 + $0x8] sm:$0xf0]  ;;  %v3303_v13 = vld [vmem:[#allocation2 + $0x4] sm:$0xf] }
  0x4b   : > { %959 = vmatpush.bf16.msra.mxu2 %v2752_v47  ;;  %v2696_v14 = vor.u32 %v3304_v12, %v2695_v11  ;;  %v2697_v15 = vld [vmem:[#allocation2 + $0xc] sm:$0xf0]  ;;  %v3544_v31 = vld [vmem:[%s4488_s27] ss:$0 sm:$0xff]  ;;  %s4491_s4 = sld [smem:[#allocation31_spill]]  ;;  %s712_s30 = sand.u32 1, %s4490_s16  }
  0x4c   : > { %v3545_v34 = vld [vmem:[%s4489_s1] ss:$0 sm:$0xff]  ;;  %s4492_s3 = sld [smem:[#allocation33_spill]]  ;;  %s713_s24 = scalar_lea.vmem [#allocation11], %s712_s30 }
  0x4d   : > { %934 = vmatpush.bf16.msra.mxu0 %v2732_v51  ;;  %v794_v38 = vld [vmem:[%s4434_s5] sm:$0x7]  ;;  %s4494_s1 = sld [smem:[#allocation32_spill]]  ;;  %s2552_s17 = scalar_lea.sflag [#allocation4], %s712_s30 }
  0x4e   : > { %947 = vmatpush.bf16.msra.mxu1 %v2736_v55  ;;  %v797_v39 = vperm.slane %v794_v38, 1  ;;  %v796_v42 = vperm.slane %v794_v38, 0  ;;  %v798_v44 = vperm.slane %v794_v38, 2 }
  0x4f   : > { %960 = vmatpush.bf16.msra.mxu2 %v2740_v56 }
  0x51   : > { %935 = vmatpush.bf16.msra.mxu0 %v2720_v60  ;;  %v4083_v60 = vld [vmem:[%s720_s23] ss:$0 sm:$0xff] }
  0x52   : > { %s2560_s27 = scalar_lea.hbm %s4492_s3, %s3957_s2  ;;  %s3764_s28 = scalar_lea.hbm %s4492_s3, 2 }
  0x53   : > { %961 = vmatpush.bf16.msra.mxu2 %v2728_v1  ;;  %s2564_s29 = sshll.u32 %s2560_s27, 4  ;;  %s2565_s29 = int_to_ptr.hbm [resolvable:$true] %s2564_s29 }
  0x54   : > { %s3758_s20 = sshra.s32 %s2565_s29, 4  ;;  %s3759_s20 = int_to_ptr.hbm [resolvable:$true] %s3758_s20 }
  0x55   : > { %936 = vmatpush.bf16.msra.mxu0 %v2708_v5  ;;  %s3760_s16 = scalar_lea.hbm %s3759_s20, 1  ;;  %p3765_p3 = scmp.lt.s32.totalorder %s3759_s20, %s4492_s3 }
  0x56   : > { %p3761_p0 = scmp.ne.s32.totalorder %s3759_s20, %s3760_s16  ;;  %p3766_p4 = scmp.lt.s32.totalorder %s3764_s28, %s3760_s16 }
  0x57   : > { %962 = vmatpush.bf16.msra.mxu2 %v2716_v10 }
  0x58   : > { %p3762_p1 = pnand %p3761_p0, %p3974_p5  ;;  %p3767_p7 = por %p3766_p4, %p3765_p3 }
  0x59   : > { %937 = vmatpush.bf16.msra.mxu0 %v2696_v14 }
  0x5a   : > { %p3763_p2 = pneg %p3762_p1 }
  0x5c   : > { %p3768_p8 = pnand %p3767_p7, %p3763_p2 }
  0xb4   : > { %v726_v17 = vpop.xlane.xlu0 %725 }
  0xb5   : > { %v734_v18 = vmul.f32 %v4048_v16, %v726_v17  ;;  %v2703_v17 = vld [vmem:[#allocation2 + $0x8] sm:$0xf] }
  0xb7   : > { %v4051_v19 = vsub.f32 %v722_v0, %v734_v18  ;;  %v2724_v0 = vor.u32 %v3309_v59, %v2721_v61  ;;  %v3305_v18 = vld [vmem:[#allocation2 + $0x10] sm:$0xf0] }
  0xb8   : > { %v2704_v21 = vor.u32 %v3305_v18, %v2703_v17 }
  0xb9   : > { %v736_v20 = vmul.f32 %v4051_v19, %v4051_v19  ;;  %948 = vmatpush.bf16.msra.mxu1 %v2724_v0 }
  0xba   : > { %963 = vmatpush.bf16.msra.mxu2 %v2704_v21 }
  0xbb   : > { %737 = vadd.xlane.f32.xlu0 %v736_v20  ;;  %v2700_v20 = vor.u32 %v3303_v13, %v2697_v15 }
  0xbd   : > { %949 = vmatpush.bf16.msra.mxu1 %v2712_v9 }
  0xc1   : > { %950 = vmatpush.bf16.msra.mxu1 %v2700_v20 }
 0x12e   : > { %v738_v22 = vpop.xlane.xlu0 %737 }
 0x12f   : > { %v739_v23 = vmul.f32 %v738_v22, %v4048_v16 }
 0x131   : > { %v740_v24 = vadd.f32 1e-12, %v739_v23 }
 0x133   : > { %3560 = vrsqrt.f32 %v740_v24  ;;  %vm747_vm2 = vweird.f32 %v740_v24 }
 0x139   : > { %v3561_v25 = vpop.eup %3560 }
 0x13a   : > { %v742_v26 = vmul.f32 %v3561_v25, %v740_v24  ;;  %vm748_vm1 = vweird.f32 %v3561_v25 }
 0x13b   : > { %vm749_vm3 = vmor %vm747_vm2, %vm748_vm1 }
 0x13c   : > { %v743_v27 = vmul.f32 %v3561_v25, %v742_v26 }
 0x13e   : > { %v744_v28 = vmul.f32 0.5, %v743_v27 }
 0x140   : > { %v745_v29 = vsub.f32 1.5, %v744_v28 }
 0x142   : > { %v746_v30 = vmul.f32 %v3561_v25, %v745_v29 }
 0x144   : > { %v750_v32 = vsel %vm749_vm3, %v3561_v25, %v746_v30 }
 0x145   : > { %v751_v33 = vmul.f32 %v750_v32, %v4051_v19 }
 0x147   : > { %v755_v35 = vmul.f32 %v3544_v31, %v751_v33 }
 0x149   : > { %v4063_v36 = vadd.f32 %v3545_v34, %v755_v35 }
 0x14b   : > { %v793_v37 = vpack.c.bf16 %v4063_v36, %v4063_v36 }
 0x14d   : > { %938 = vmatmul.bf16.vlgmr.msra.gmra.mxu0 %v793_v37  ;;  %951 = vmatmul.bf16.vlgmr.msra.gmra.mxu1 %v793_v37 }
 0x14e   : > { %964 = vmatmul.bf16.vlgmr.msra.gmra.mxu2 %v793_v37 }
 0x1ca   : > { %v939_v40 = vpop.f32.mrf.mxu0  ;;  %v952_v19 = vpop.f32.mrf.mxu1 }
 0x1cb   : > { %v953_v41 = vadd.f32 %v952_v19, %v797_v39  ;;  %v940_v46 = vadd.f32 %v939_v40, %v796_v42 }
 0x1cd   : > { %v970_v43 = vpack.c.bf16 %v953_v41, %v953_v41  ;;  %v969_v52 = vpack.c.bf16 %v940_v46, %v940_v46 }
 0x1cf   : > { %1047 = vrot.lane.b32.xlu2 %v970_v43, %s3830_s26  ;;  %v977_v45 = vsel %vm972_vm4, %v970_v43, 0 }
 0x1d0   : > { %986 = vmatpush.bf16.xpose.msrb.mxu0 %v977_v45 }
 0x1d1   : > { %v965_v47 = vpop.f32.mrf.mxu2 }
 0x1d2   : > { %v966_v48 = vadd.f32 %v965_v47, %v798_v44  ;;  %v941_v49 = vpop.f32.mrf.mxu0  ;;  %v954_v50 = vpop.f32.mrf.mxu1  ;;  %v3334_v47 = vld [vmem:[#allocation5 + $0x38] sm:$0xff] }
 0x1d3   : > { %1191 = vmatpush.bf16.msrb.mxu1 %v3334_v47  ;;  %v3332_v49 = vld [vmem:[#allocation5 + $0x28] sm:$0xff]  ;;  %v3331_v50 = vld [vmem:[#allocation5 + $0x20] sm:$0xff]  ;;  %v2837_v47 = vld [vmem:[%s4439_s10 + $0x18] sm:$0xf0] }
 0x1d4   : > { %v971_v51 = vpack.c.bf16 %v966_v48, %v966_v48  ;;  %v3333_v48 = vld [vmem:[#allocation5 + $0x30] sm:$0xff] }
 0x1d6   : > { %v1028_v53 = vsel %vm1026_vm5, %v971_v51, 0 }
 0x1d7   : > { %1037 = vmatpush.bf16.msra.mxu3 %v1028_v53  ;;  %1044 = vrot.lane.b32.xlu2 %v969_v52, %s3830_s26  ;;  %v3328_v53 = vld [vmem:[#allocation5 + $0x8] sm:$0xff] }
 0x1d8   : > { %2789 = vmatmul.msk.bf16.vlgmr.msrb.gmra.mxu0 %vm972_vm4, %v969_v52  ;;  %1192 = vmatpush.bf16.msrb.mxu1 %v3333_v48  ;;  %v3329_v52 = vld [vmem:[#allocation5 + $0x10] sm:$0xff] }
 0x1d9   : > { %v967_v54 = vpop.f32.mrf.mxu2 }
 0x1dc   : > { %1193 = vmatpush.bf16.msrb.mxu1 %v3332_v49  ;;  %v2827_v49 = vld [vmem:[%s4439_s10] sm:$0xf] }
 0x1df   : > { %1096 = vrot.lane.b32.xlu2 %v971_v51, %s3830_s26  ;;  %v3330_v51 = vld [vmem:[#allocation5 + $0x18] sm:$0xff] }
 0x1e0   : > { %1194 = vmatpush.bf16.msrb.mxu1 %v3331_v50  ;;  %v3336_v50 = vld [vmem:[%s4439_s10 + $0x4] sm:$0xf0] }
 0x1e4   : > { %1195 = vmatpush.bf16.msrb.mxu1 %v3330_v51  ;;  %v3335_v51 = vld [vmem:[%s4439_s10 + $0x4] sm:$0xf] }
 0x1e8   : > { %1196 = vmatpush.bf16.msrb.mxu1 %v3329_v52  ;;  %v2828_v52 = vor.u32 %v3336_v50, %v2827_v49 }
 0x1ec   : > { %1197 = vmatpush.bf16.msrb.mxu1 %v3328_v53  ;;  %v2829_v53 = vld [vmem:[%s4439_s10 + $0x8] sm:$0xf0] }
 0x229   : > { %v1048_v55 = vpop.permute.xlu2 %1047 }
 0x22a   : > { %v1053_v56 = vsel %vm972_vm4, %v1048_v55, 0 }
 0x22b   : > { %1062 = vmatpush.bf16.xpose.msrb.mxu3 %v1053_v56  ;;  %v3327_v56 = vld [vmem:[#allocation5] sm:$0xff] }
 0x22c   : > { %1198 = vmatpush.bf16.msrb.mxu1 %v3327_v56  ;;  %v3366_v56 = vld [vmem:[#allocation7 + $0x78] sm:$0xff] }
 0x230   : > { %1529 = vmatpush.bf16.msra.mxu1 %v3366_v56 }
 0x231   : > { %v1045_v57 = vpop.permute.xlu2 %1044 }
 0x239   : > { %v1097_v58 = vpop.permute.xlu2 %1096 }
 0x23a   : > { %v1102_v59 = vsel %vm1026_vm5, %v1097_v58, 0 }
 0x23b   : > { %1111 = vmatpush.bf16.msra.mxu0 %v1102_v59 }
 0x255   : > { %v988_v61 = vpop.f32.mrf.mxu0 }
 0x256   : > { %v992_v62 = vmul.f32 0.125, %v988_v61  ;;  %v3546_v61 = vld [vmem:[%s4436_s7] ss:$0 sm:$0xff] }
 0x258   : > { %v996_v63 = vadd.f32 %v4083_v60, %v992_v62 }
 0x25a   : > { %v998_v0 = vsel %vm997_vm6, %v996_v63, -inf }
 0x25b   : > { %999 = vmax.xlane.f32.xlu1 %v998_v0 }
 0x25d   : > { %v990_v1 = vpop.f32.mrf.mxu0 }
 0x2ce   : > { %v1000_v2 = vpop.xlane.xlu1 %999 }
 0x2cf   : > { %v1001_v3 = vsub.f32 %v996_v63, %v1000_v2  ;;  %v2883_v2 = vld [vmem:[%s4439_s10 + $0x70] sm:$0xf] }
 0x2d1   : > { %v1002_v4 = vmul.f32 1.442695, %v1001_v3  ;;  %v3350_v3 = vld [vmem:[%s4439_s10 + $0x74] sm:$0xf0] }
 0x2d3   : > { %3562 = vpow2.f32 %v1002_v4  ;;  %v3349_v4 = vld [vmem:[%s4439_s10 + $0x74] sm:$0xf] }
 0x2d9   : > { %v3563_v5 = vpop.eup %3562 }
 0x2da   : > { %v1004_v6 = vsel %vm997_vm6, %v3563_v5, 0.0 }
 0x2db   : > { %1005 = vadd.xlane.f32.xlu1 %v1004_v6  ;;  %v2885_v6 = vld [vmem:[%s4439_s10 + $0x78] sm:$0xf0] }
 0x34e   : > { %v1006_v7 = vpop.xlane.xlu1 %1005 }
 0x34f   : > { %3564 = vrcp.f32 %v1006_v7  ;;  %v1018_v11 = vand.u32 2147483648, %v1006_v7  ;;  %v1016_v13 = vand.u32 2147483647, %v1006_v7  ;;  %vm1012_vm8 = vweird.f32 %v1006_v7 }
 0x351   : > { %v1019_v15 = vor.u32 1.1754944e-38, %v1018_v11  ;;  %vm1017_vm10 = vcmp.eq.f32.partialorder %v1016_v13, 8.507059e+37  ;;  %v2875_v11 = vld [vmem:[%s4439_s10 + $0x60] sm:$0xf]  ;;  %v3347_v13 = vld [vmem:[%s4439_s10 + $0x64] sm:$0xf] }
 0x355   : > { %v3565_v8 = vpop.eup %3564 }
 0x356   : > { %v1008_v9 = vmul.f32 %v3565_v8, %v1006_v7  ;;  %vm1013_vm7 = vweird.f32 %v3565_v8 }
 0x357   : > { %vm1014_vm9 = vmor %vm1012_vm8, %vm1013_vm7 }
 0x358   : > { %v1009_v10 = vsub.f32 1.0, %v1008_v9 }
 0x35a   : > { %v1010_v12 = vmul.f32 %v3565_v8, %v1009_v10 }
 0x35c   : > { %v1011_v14 = vadd.f32 %v3565_v8, %v1010_v12  ;;  %v3348_v12 = vld [vmem:[%s4439_s10 + $0x64] sm:$0xf0] }
 0x35e   : > { %v1015_v17 = vsel %vm1014_vm9, %v3565_v8, %v1011_v14  ;;  %v2876_v14 = vor.u32 %v3348_v12, %v2875_v11  ;;  %v3365_v11 = vld [vmem:[#allocation7 + $0x70] sm:$0xff]  ;;  %v3356_v12 = vld [vmem:[#allocation7 + $0x28] sm:$0xff] }
 0x35f   : > { %v1020_v18 = vsel %vm1017_vm10, %v1019_v15, %v1015_v17  ;;  %v2877_v15 = vld [vmem:[%s4439_s10 + $0x68] sm:$0xf0]  ;;  %1530 = vmatpush.bf16.msra.mxu1 %v3365_v11 }
 0x360   : > { %v1021_v20 = vmul.f32 %v3563_v5, %v1020_v18  ;;  %v2884_v5 = vor.u32 %v3350_v3, %v2883_v2  ;;  %v2880_v17 = vor.u32 %v3347_v13, %v2877_v15  ;;  %v2867_v18 = vld [vmem:[%s4439_s10 + $0x50] sm:$0xf]  ;;  %v3547_v3 = vld [vmem:[%s4437_s8] ss:$0 sm:$0xff]  ;;  %v3364_v13 = vld [vmem:[#allocation7 + $0x68] sm:$0xff] }
 0x361   : > { %v3354_v15 = vld [vmem:[#allocation7 + $0x18] sm:$0xff] }
 0x362   : > { %v1022_v21 = vpack.c.bf16 %v1021_v20, %v1021_v20  ;;  %1338 = vmatpush.bf16.msrb.mxu2 %v2884_v5  ;;  %v3346_v20 = vld [vmem:[%s4439_s10 + $0x54] sm:$0xf0] }
 0x363   : > { %1531 = vmatpush.bf16.msra.mxu1 %v3364_v13  ;;  %v3386_v13 = vld [vmem:[#allocation2 + $0x158] sm:$0xf0] }
 0x364   : > { %2790 = vmatmul.msk.bf16.vlgmr.msra.gmra.mxu3 %vm997_vm6, %v1022_v21  ;;  %v3345_v21 = vld [vmem:[%s4439_s10 + $0x54] sm:$0xf] }
 0x366   : > { %1339 = vmatpush.bf16.msrb.mxu2 %v2876_v14  ;;  %v3363_v14 = vld [vmem:[#allocation7 + $0x60] sm:$0xff] }
 0x367   : > { %1532 = vmatpush.bf16.msra.mxu1 %v3363_v14 }
 0x374   : > { %2791 = vmatmul.msk.bf16.vlgmr.msrb.gmra.mxu3 %vm972_vm4, %v1045_v57 }
 0x3e7   : > { %v1039_v22 = vpop.f32.mrf.mxu3 }
 0x3ef   : > { %v1041_v23 = vpop.f32.mrf.mxu3 }
 0x3f0   : > { %v2869_v23 = vld [vmem:[%s4439_s10 + $0x58] sm:$0xf0] }
 0x3f7   : > { %v1064_v24 = vpop.f32.mrf.mxu3 }
 0x3f8   : > { %v1068_v25 = vmul.f32 0.125, %v1064_v24  ;;  %v2872_v24 = vor.u32 %v3345_v21, %v2869_v23  ;;  %v3352_v21 = vld [vmem:[#allocation7 + $0x8] sm:$0xff]  ;;  %v3351_v23 = vld [vmem:[#allocation7] sm:$0xff] }
 0x3fa   : > { %v1069_v26 = vadd.f32 %v4083_v60, %v1068_v25  ;;  %v2859_v25 = vld [vmem:[%s4439_s10 + $0x40] sm:$0xf] }
 0x3fc   : > { %v1070_v27 = vsel %vm997_vm6, %v1069_v26, -inf }
 0x3fd   : > { %1071 = vmax.xlane.f32.xlu0 %v1070_v27  ;;  %v3343_v27 = vld [vmem:[%s4439_s10 + $0x44] sm:$0xf] }
 0x3ff   : > { %v1066_v28 = vpop.f32.mrf.mxu3 }
 0x470   : > { %v1072_v29 = vpop.xlane.xlu0 %1071 }
 0x471   : > { %v1073_v30 = vsub.f32 %v1069_v26, %v1072_v29  ;;  %v3344_v26 = vld [vmem:[%s4439_s10 + $0x44] sm:$0xf0]  ;;  %v2861_v29 = vld [vmem:[%s4439_s10 + $0x48] sm:$0xf0] }
 0x472   : > { %v2860_v28 = vor.u32 %v3344_v26, %v2859_v25  ;;  %v1252_v25 = vld [vmem:[%s4440_s11] sm:$0x3] }
 0x473   : > { %v1074_v31 = vmul.f32 1.442695, %v1073_v30  ;;  %v2864_v30 = vor.u32 %v3343_v27, %v2861_v29  ;;  %v1254_v26 = vperm.slane %v1252_v25, 0  ;;  %v1255_v27 = vperm.slane %v1252_v25, 1 }
 0x475   : > { %3566 = vpow2.f32 %v1074_v31  ;;  %v2851_v31 = vld [vmem:[%s4439_s10 + $0x30] sm:$0xf] }
 0x47b   : > { %v3567_v32 = vpop.eup %3566 }
 0x47c   : > { %v1076_v33 = vsel %vm997_vm6, %v3567_v32, 0.0 }
 0x47d   : > { %1077 = vadd.xlane.f32.xlu1 %v1076_v33  ;;  %v3341_v33 = vld [vmem:[%s4439_s10 + $0x34] sm:$0xf] }
 0x4f0   : > { %v1078_v34 = vpop.xlane.xlu1 %1077 }
 0x4f1   : > { %3568 = vrcp.f32 %v1078_v34  ;;  %v1090_v39 = vand.u32 2147483648, %v1078_v34  ;;  %v1088_v19 = vand.u32 2147483647, %v1078_v34  ;;  %vm1084_vm12 = vweird.f32 %v1078_v34 }
 0x4f3   : > { %v1091_v42 = vor.u32 1.1754944e-38, %v1090_v39  ;;  %vm1089_vm14 = vcmp.eq.f32.partialorder %v1088_v19, 8.507059e+37  ;;  %v3340_v39 = vld [vmem:[%s4439_s10 + $0x24] sm:$0xf0] }
 0x4f7   : > { %v3569_v35 = vpop.eup %3568 }
 0x4f8   : > { %v1080_v37 = vmul.f32 %v3569_v35, %v1078_v34  ;;  %vm1085_vm11 = vweird.f32 %v3569_v35 }
 0x4f9   : > { %vm1086_vm13 = vmor %vm1084_vm12, %vm1085_vm11 }
 0x4fa   : > { %v1081_v38 = vsub.f32 1.0, %v1080_v37 }
 0x4fc   : > { %v1082_v40 = vmul.f32 %v3569_v35, %v1081_v38  ;;  %v2843_v38 = vld [vmem:[%s4439_s10 + $0x20] sm:$0xf] }
 0x4fd   : > { %v2844_v19 = vor.u32 %v3340_v39, %v2843_v38 }
 0x4fe   : > { %v1083_v41 = vadd.f32 %v3569_v35, %v1082_v40  ;;  %v3339_v40 = vld [vmem:[%s4439_s10 + $0x24] sm:$0xf] }
 0x500   : > { %v1087_v43 = vsel %vm1086_vm13, %v3569_v35, %v1083_v41  ;;  %v2853_v35 = vld [vmem:[%s4439_s10 + $0x38] sm:$0xf0]  ;;  %v2845_v41 = vld [vmem:[%s4439_s10 + $0x28] sm:$0xf0] }
 0x501   : > { %v1092_v44 = vsel %vm1089_vm14, %v1091_v42, %v1087_v43  ;;  %v2856_v37 = vor.u32 %v3341_v33, %v2853_v35  ;;  %v2848_v42 = vor.u32 %v3339_v40, %v2845_v41  ;;  %v2835_v43 = vld [vmem:[%s4439_s10 + $0x10] sm:$0xf] }
 0x502   : > { %v1093_v45 = vmul.f32 %v3567_v32, %v1092_v44  ;;  %v3342_v32 = vld [vmem:[%s4439_s10 + $0x34] sm:$0xf0] }
 0x503   : > { %v2852_v34 = vor.u32 %v3342_v32, %v2851_v31  ;;  %v3338_v44 = vld [vmem:[%s4439_s10 + $0x14] sm:$0xf0] }
 0x504   : > { %v1094_v46 = vpack.c.bf16 %v1093_v45, %v1093_v45  ;;  %v3337_v45 = vld [vmem:[%s4439_s10 + $0x14] sm:$0xf] }
 0x505   : > { %v2840_v48 = vor.u32 %v3337_v45, %v2837_v47 }
 0x506   : > { %2792 = vmatmul.msk.bf16.vlgmr.msra.gmra.mxu0 %vm997_vm6, %v1094_v46  ;;  %v2836_v46 = vor.u32 %v3338_v44, %v2835_v43 }
 0x583   : > { %v1113_v54 = vpop.f32.mrf.mxu0 }
 0x584   : > { %1118 = vrot.lane.b32.xlu0 %v1113_v54, %s3830_s26  ;;  %v2832_v54 = vor.u32 %v3335_v51, %v2829_v53 }
 0x58b   : > { %v1115_v55 = vpop.f32.mrf.mxu0 }
 0x58c   : > { %v3358_v55 = vld [vmem:[#allocation7 + $0x38] sm:$0xff] }
 0x58d   : > { %1516 = vmatpush.bf16.msrb.mxu0 %v3358_v55 }
 0x5f6   : > { %v1119_v57 = vpop.permute.xlu0 %1118 }
 0x5f7   : > { %v1121_v58 = vsel %vm972_vm4, %v1039_v22, %v1119_v57  ;;  %v2868_v22 = vor.u32 %v3346_v20, %v2867_v18  ;;  %v3353_v18 = vld [vmem:[#allocation7 + $0x10] sm:$0xff] }
 0x5f8   : > { %v1138_v59 = vpack.c.bf16 %v1121_v58, %v1121_v58  ;;  %v3361_v20 = vld [vmem:[#allocation7 + $0x50] sm:$0xff] }
 0x5f9   : > { %1340 = vmatpush.bf16.msrb.mxu2 %v2868_v22  ;;  %v3360_v22 = vld [vmem:[#allocation7 + $0x48] sm:$0xff] }
 0x5fa   : > { %1199 = vmatmul.bf16.vlgmr.msrb.gmra.mxu1 %v1138_v59 }
 0x5fd   : > { %1341 = vmatpush.bf16.msrb.mxu2 %v2860_v28 }
 0x601   : > { %1342 = vmatpush.bf16.msrb.mxu2 %v2852_v34 }
 0x605   : > { %1343 = vmatpush.bf16.msrb.mxu2 %v2844_v19 }
 0x609   : > { %1344 = vmatpush.bf16.msrb.mxu2 %v2836_v46 }
 0x60d   : > { %1345 = vmatpush.bf16.msrb.mxu2 %v2828_v52 }
 0x677   : > { %v1200_v62 = vpop.f32.mrf.mxu1 }
 0x678   : > { %v1201_v63 = vadd.f32 %v3546_v61, %v1200_v62 }
 0x67a   : > { %v1204_v0 = vadd.f32 %v1201_v63, %v4063_v36  ;;  %v2888_v36 = vor.u32 %v3349_v4, %v2885_v6  ;;  %v3548_v6 = vld [vmem:[%s4438_s9] ss:$0 sm:$0xff] }
 0x67c   : > { %1207 = vadd.xlane.f32.xlu1 %v1204_v0  ;;  %1351 = vmatpush.bf16.msra.mxu3 %v2888_v36 }
 0x67f   : > { %v1202_v1 = vpop.f32.mrf.mxu1 }
 0x680   : > { %1352 = vmatpush.bf16.msra.mxu3 %v2880_v17  ;;  %v3362_v17 = vld [vmem:[#allocation7 + $0x58] sm:$0xff] }
 0x681   : > { %1533 = vmatpush.bf16.msra.mxu1 %v3362_v17  ;;  %v3036_v17 = vld [vmem:[#allocation2 + $0x158] sm:$0xf] }
 0x684   : > { %1353 = vmatpush.bf16.msra.mxu3 %v2872_v24  ;;  %v3359_v24 = vld [vmem:[#allocation7 + $0x40] sm:$0xff] }
 0x685   : > { %1534 = vmatpush.bf16.msra.mxu1 %v3361_v20 }
 0x688   : > { %1354 = vmatpush.bf16.msra.mxu3 %v2864_v30 }
 0x689   : > { %1535 = vmatpush.bf16.msra.mxu1 %v3360_v22  ;;  %v3016_v22 = vld [vmem:[#allocation2 + $0x138] sm:$0xf] }
 0x68c   : > { %1355 = vmatpush.bf16.msra.mxu3 %v2856_v37 }
 0x68d   : > { %1536 = vmatpush.bf16.msra.mxu1 %v3359_v24  ;;  %v3382_v24 = vld [vmem:[#allocation2 + $0x13c] sm:$0xf] }
 0x690   : > { %1356 = vmatpush.bf16.msra.mxu3 %v2848_v42 }
 0x694   : > { %1357 = vmatpush.bf16.msra.mxu3 %v2840_v48 }
 0x698   : > { %1358 = vmatpush.bf16.msra.mxu3 %v2832_v54  ;;  %v3549_v54 = vld [vmem:[%s4442_s13] ss:$0 sm:$0xff] }
 0x6ef   : > { %v1208_v7 = vpop.xlane.xlu1 %1207 }
 0x6f0   : > { %v1209_v8 = vmul.f32 %v1208_v7, %v4048_v16 }
 0x6f2   : > { %v4113_v9 = vsub.f32 %v1204_v0, %v1209_v8 }
 0x6f4   : > { %v1211_v10 = vmul.f32 %v4113_v9, %v4113_v9 }
 0x6f6   : > { %1212 = vadd.xlane.f32.xlu2 %v1211_v10  ;;  %v3357_v10 = vld [vmem:[#allocation7 + $0x30] sm:$0xff] }
 0x6f7   : > { %1517 = vmatpush.bf16.msrb.mxu0 %v3357_v10 }
 0x6fb   : > { %1518 = vmatpush.bf16.msrb.mxu0 %v3356_v12  ;;  %v3028_v12 = vld [vmem:[#allocation2 + $0x150] sm:$0xf] }
 0x6fc   : > { %v3029_v14 = vor.u32 %v3386_v13, %v3028_v12 }
 0x769   : > { %v1213_v57 = vpop.xlane.xlu2 %1212 }
 0x76a   : > { %v1214_v58 = vmul.f32 %v1213_v57, %v4048_v16 }
 0x76c   : > { %v1215_v59 = vadd.f32 1e-12, %v1214_v58 }
 0x76e   : > { %3570 = vrsqrt.f32 %v1215_v59  ;;  %vm1222_vm0 = vweird.f32 %v1215_v59 }
 0x774   : > { %v3571_v61 = vpop.eup %3570 }
 0x775   : > { %v1217_v62 = vmul.f32 %v3571_v61, %v1215_v59  ;;  %vm1223_vm15 = vweird.f32 %v3571_v61 }
 0x776   : > { %vm1224_vm1 = vmor %vm1222_vm0, %vm1223_vm15 }
 0x777   : > { %v1218_v63 = vmul.f32 %v3571_v61, %v1217_v62 }
 0x779   : > { %v1219_v0 = vmul.f32 0.5, %v1218_v63  ;;  %v3040_v63 = vld [vmem:[#allocation2 + $0x168] sm:$0xf] }
 0x77b   : > { %v1220_v1 = vsub.f32 1.5, %v1219_v0  ;;  %v3389_v0 = vld [vmem:[#allocation2 + $0x170] sm:$0xf0] }
 0x77d   : > { %v1221_v2 = vmul.f32 %v3571_v61, %v1220_v1  ;;  %v3388_v1 = vld [vmem:[#allocation2 + $0x16c] sm:$0xf] }
 0x77f   : > { %v1225_v4 = vsel %vm1224_vm1, %v3571_v61, %v1221_v2  ;;  %v3041_v2 = vor.u32 %v3389_v0, %v3040_v63  ;;  %v2970_v63 = vld [vmem:[#allocation2 + $0xe4] sm:$0xf0]  ;;  %v2976_v0 = vld [vmem:[#allocation2 + $0xe0] sm:$0xf] }
 0x780   : > { %v1226_v5 = vmul.f32 %v1225_v4, %v4113_v9  ;;  %v3355_v9 = vld [vmem:[#allocation7 + $0x20] sm:$0xff]  ;;  %v3048_v4 = vld [vmem:[#allocation2 + $0x170] sm:$0xf] }
 0x781   : > { %1519 = vmatpush.bf16.msrb.mxu0 %v3355_v9  ;;  %1744 = vmatpush.bf16.msra.mxu2 %v3041_v2  ;;  %v3385_v9 = vld [vmem:[#allocation2 + $0x154] sm:$0xf] }
 0x782   : > { %v1230_v36 = vmul.f32 %v3547_v3, %v1226_v5  ;;  %v3042_v3 = vld [vmem:[#allocation2 + $0x174] sm:$0xf0]  ;;  %v3390_v5 = vld [vmem:[#allocation2 + $0x178] sm:$0xf0] }
 0x784   : > { %v4209_v7 = vadd.f32 %v3548_v6, %v1230_v36  ;;  %v3045_v6 = vor.u32 %v3388_v1, %v3042_v3  ;;  %v3049_v36 = vor.u32 %v3390_v5, %v3048_v4  ;;  %v3372_v1 = vld [vmem:[#allocation2 + $0xe8] sm:$0xf0]  ;;  %v2956_v4 = vld [vmem:[#allocation2 + $0xc0] sm:$0xf] }
 0x785   : > { %1520 = vmatpush.bf16.msrb.mxu0 %v3354_v15  ;;  %v3030_v15 = vld [vmem:[#allocation2 + $0x15c] sm:$0xf0]  ;;  %1745 = vmatpush.bf16.msra.mxu2 %v3029_v14  ;;  %v2977_v3 = vor.u32 %v3372_v1, %v2976_v0  ;;  %v3368_v5 = vld [vmem:[#allocation2 + $0xc8] sm:$0xf0] }
 0x786   : > { %v1251_v8 = vpack.c.bf16 %v4209_v7, %v4209_v7  ;;  %1757 = vmatpush.bf16.msrb.mxu3 %v3045_v6  ;;  %v3033_v20 = vor.u32 %v3385_v9, %v3030_v15  ;;  %v3367_v6 = vld [vmem:[#allocation2 + $0xc4] sm:$0xf] }
 0x788   : > { %1346 = vmatmul.bf16.vlgmr.msrb.gmra.mxu2 %v1251_v8  ;;  %1359 = vmatmul.bf16.vlgmr.msra.gmra.mxu3 %v1251_v8 }
 0x789   : > { %1521 = vmatpush.bf16.msrb.mxu0 %v3353_v18  ;;  %v3387_v18 = vld [vmem:[#allocation2 + $0x160] sm:$0xf0] }
 0x78a   : > { %1758 = vmatpush.bf16.msrb.mxu3 %v3033_v20 }
 0x78d   : > { %1522 = vmatpush.bf16.msrb.mxu0 %v3352_v21  ;;  %v3037_v21 = vor.u32 %v3387_v18, %v3036_v17 }
 0x791   : > { %1523 = vmatpush.bf16.msrb.mxu0 %v3351_v23  ;;  %v3383_v23 = vld [vmem:[#allocation2 + $0x140] sm:$0xf0] }
 0x792   : > { %v3017_v25 = vor.u32 %v3383_v23, %v3016_v22 }
 0x794   : > { %1746 = vmatpush.bf16.msra.mxu2 %v3017_v25 }
 0x795   : > { %1770 = vmatpush.bf16.msra.mxu0 %v3049_v36  ;;  %v2957_v36 = vor.u32 %v3368_v5, %v2956_v4 }
 0x799   : > { %1771 = vmatpush.bf16.msra.mxu0 %v3037_v21 }
 0x80b   : > { %v1347_v28 = vpop.f32.mrf.mxu2  ;;  %v1360_v29 = vpop.f32.mrf.mxu3 }
 0x80c   : > { %v1348_v30 = vadd.f32 %v1347_v28, %v1254_v26  ;;  %v1361_v31 = vadd.f32 %v1360_v29, %v1255_v27  ;;  %v3018_v26 = vld [vmem:[#allocation2 + $0x144] sm:$0xf0]  ;;  %v3024_v27 = vld [vmem:[#allocation2 + $0x140] sm:$0xf]  ;;  %v3384_v28 = vld [vmem:[#allocation2 + $0x148] sm:$0xf0] }
 0x80d   : > { %v3021_v29 = vor.u32 %v3382_v24, %v3018_v26  ;;  %v3550_v24 = vld [vmem:[%s4443_s14] ss:$0 sm:$0xff] }
 0x80e   : > { %v1364_v32 = vmul.f32 %v1348_v30, %v1348_v30  ;;  %v1365_v33 = vmul.f32 %v1361_v31, %v1361_v31 }
 0x80f   : > { %1759 = vmatpush.bf16.msrb.mxu3 %v3021_v29 }
 0x810   : > { %v1366_v34 = vmul.f32 %v1364_v32, %v1348_v30  ;;  %v1367_v35 = vmul.f32 %v1365_v33, %v1361_v31  ;;  %v3380_v32 = vld [vmem:[#allocation2 + $0x128] sm:$0xf0]  ;;  %v3379_v33 = vld [vmem:[#allocation2 + $0x124] sm:$0xf] }
 0x812   : > { %v1368_v37 = vmul.f32 0.044715, %v1366_v34  ;;  %v1369_v38 = vmul.f32 0.044715, %v1367_v35  ;;  %v3006_v35 = vld [vmem:[#allocation2 + $0x12c] sm:$0xf0] }
 0x813   : > { %v1349_v39 = vpop.f32.mrf.mxu2  ;;  %v1362_v40 = vpop.f32.mrf.mxu3 }
 0x814   : > { %v1370_v19 = vadd.f32 %v1368_v37, %v1348_v30  ;;  %v1371_v41 = vadd.f32 %v1369_v38, %v1361_v31  ;;  %v3012_v37 = vld [vmem:[#allocation2 + $0x128] sm:$0xf]  ;;  %v3381_v38 = vld [vmem:[#allocation2 + $0x130] sm:$0xf0]  ;;  %v3009_v39 = vor.u32 %v3379_v33, %v3006_v35 }
 0x815   : > { %v3013_v40 = vor.u32 %v3381_v38, %v3012_v37 }
 0x816   : > { %v1372_v42 = vmul.f32 0.7978846, %v1370_v19  ;;  %v1373_v43 = vmul.f32 0.7978846, %v1371_v41  ;;  %1760 = vmatpush.bf16.msrb.mxu3 %v3009_v39  ;;  %v2992_v19 = vld [vmem:[#allocation2 + $0x108] sm:$0xf] }
 0x817   : > { %v3377_v41 = vld [vmem:[#allocation2 + $0x110] sm:$0xf0] }
 0x818   : > { %3572 = vtanh.f32 %v1372_v42  ;;  %v3376_v42 = vld [vmem:[#allocation2 + $0x10c] sm:$0xf] }
 0x819   : > { %3574 = vtanh.f32 %v1373_v43  ;;  %v2993_v43 = vor.u32 %v3377_v41, %v2992_v19 }
 0x81e   : > { %v3573_v44 = vpop.eup %3572 }
 0x81f   : > { %v3575_v45 = vpop.eup %3574  ;;  %v1376_v46 = vadd.f32 1.0, %v3573_v44  ;;  %v2994_v44 = vld [vmem:[#allocation2 + $0x114] sm:$0xf0] }
 0x820   : > { %v1377_v47 = vadd.f32 1.0, %v3575_v45  ;;  %v3000_v45 = vld [vmem:[#allocation2 + $0x110] sm:$0xf] }
 0x821   : > { %v1378_v48 = vmul.f32 0.5, %v1376_v46  ;;  %v3378_v46 = vld [vmem:[#allocation2 + $0x118] sm:$0xf0] }
 0x822   : > { %v1379_v49 = vmul.f32 0.5, %v1377_v47  ;;  %v2997_v47 = vor.u32 %v3376_v42, %v2994_v44 }
 0x823   : > { %v1380_v50 = vmul.f32 %v1378_v48, %v1348_v30  ;;  %v3025_v30 = vor.u32 %v3384_v28, %v3024_v27  ;;  %v3001_v48 = vor.u32 %v3378_v46, %v3000_v45  ;;  %v3551_v27 = vld [vmem:[%s4444_s15] ss:$0 sm:$0xff] }
 0x824   : > { %v1381_v51 = vmul.f32 %v1379_v49, %v1361_v31  ;;  %v3004_v31 = vld [vmem:[#allocation2 + $0x120] sm:$0xf]  ;;  %1761 = vmatpush.bf16.msrb.mxu3 %v2997_v47  ;;  %v2980_v49 = vld [vmem:[#allocation2 + $0xf0] sm:$0xf] }
 0x825   : > { %v1414_v52 = vpack.c.bf16 %v1380_v50, %v1380_v50  ;;  %1772 = vmatpush.bf16.msra.mxu0 %v3025_v30  ;;  %v3005_v34 = vor.u32 %v3380_v32, %v3004_v31  ;;  %v3374_v50 = vld [vmem:[#allocation2 + $0xf8] sm:$0xf0]  ;;  %v2953_v31 = vld [vmem:[%s4434_s5 + $0x3] sm:$0x7] }
 0x826   : > { %v1415_v53 = vpack.c.bf16 %v1381_v51, %v1381_v51  ;;  %v3373_v51 = vld [vmem:[#allocation2 + $0xf4] sm:$0xf]  ;;  %v1612_v32 = vperm.slane %v2953_v31, 2  ;;  %v1611_v35 = vperm.slane %v2953_v31, 1 }
 0x827   : > { %1524 = vmatmul.bf16.vlgmr.msrb.gmra.mxu0 %v1414_v52  ;;  %1747 = vmatpush.bf16.msra.mxu2 %v3005_v34  ;;  %v2981_v52 = vor.u32 %v3374_v50, %v2980_v49  ;;  %v1610_v34 = vperm.slane %v2953_v31, 0 }
 0x828   : > { %1537 = vmatmul.bf16.vlgmr.msra.gmra.mxu1 %v1415_v53  ;;  %v2982_v53 = vld [vmem:[#allocation2 + $0xfc] sm:$0xf0] }
 0x829   : > { %1773 = vmatpush.bf16.msra.mxu0 %v3013_v40 }
 0x82b   : > { %1748 = vmatpush.bf16.msra.mxu2 %v2993_v43 }
 0x82d   : > { %1774 = vmatpush.bf16.msra.mxu0 %v3001_v48 }
 0x82f   : > { %1749 = vmatpush.bf16.msra.mxu2 %v2981_v52 }
 0x8a4   : > { %v1525_v55 = vpop.f32.mrf.mxu0 }
 0x8a5   : > { %v1526_v56 = vadd.f32 %v3549_v54, %v1525_v55  ;;  %v1538_v57 = vpop.f32.mrf.mxu1  ;;  %v2988_v54 = vld [vmem:[#allocation2 + $0xf8] sm:$0xf]  ;;  %v3375_v55 = vld [vmem:[#allocation2 + $0x100] sm:$0xf0] }
 0x8a7   : > { %v1539_v58 = vadd.f32 %v1538_v57, %v1526_v56  ;;  %v2985_v56 = vor.u32 %v3373_v51, %v2982_v53  ;;  %v2989_v57 = vor.u32 %v3375_v55, %v2988_v54 }
 0x8a9   : > { %v1542_v59 = vadd.f32 %v1539_v58, %v4209_v7  ;;  %1762 = vmatpush.bf16.msrb.mxu3 %v2985_v56  ;;  %1775 = vmatpush.bf16.msra.mxu0 %v2989_v57  ;;  %v2968_v58 = vld [vmem:[#allocation2 + $0xd8] sm:$0xf] }
 0x8ab   : > { %1545 = vadd.xlane.f32.xlu1 %v1542_v59 }
 0x8ac   : > { %v1527_v61 = vpop.f32.mrf.mxu0 }
 0x8ad   : > { %v1540_v62 = vpop.f32.mrf.mxu1  ;;  %v3370_v61 = vld [vmem:[#allocation2 + $0xdc] sm:$0xf]  ;;  %1776 = vmatpush.bf16.msra.mxu0 %v2977_v3 }
 0x8ae   : > { %v2973_v2 = vor.u32 %v3370_v61, %v2970_v63 }
 0x8b0   : > { %1763 = vmatpush.bf16.msrb.mxu3 %v2973_v2 }
 0x91e   : > { %v1546_v8 = vpop.xlane.xlu1 %1545 }
 0x91f   : > { %v1547_v10 = vmul.f32 %v1546_v8, %v4048_v16  ;;  %v2958_v8 = vld [vmem:[#allocation2 + $0xcc] sm:$0xf0] }
 0x920   : > { %v2961_v12 = vor.u32 %v3367_v6, %v2958_v8 }
 0x921   : > { %v4221_v11 = vsub.f32 %v1542_v59, %v1547_v10  ;;  %v3371_v59 = vld [vmem:[#allocation2 + $0xe0] sm:$0xf0]  ;;  %v2964_v10 = vld [vmem:[#allocation2 + $0xc8] sm:$0xf] }
 0x922   : > { %v2969_v62 = vor.u32 %v3371_v59, %v2968_v58  ;;  %1764 = vmatpush.bf16.msrb.mxu3 %v2961_v12 }
 0x923   : > { %v1549_v7 = vmul.f32 %v4221_v11, %v4221_v11 }
 0x924   : > { %1750 = vmatpush.bf16.msra.mxu2 %v2969_v62 }
 0x925   : > { %1550 = vadd.xlane.f32.xlu1 %v1549_v7  ;;  %v3369_v7 = vld [vmem:[#allocation2 + $0xd0] sm:$0xf0] }
 0x926   : > { %v2965_v13 = vor.u32 %v3369_v7, %v2964_v10 }
 0x928   : > { %1751 = vmatpush.bf16.msra.mxu2 %v2957_v36  ;;  %1777 = vmatpush.bf16.msra.mxu0 %v2965_v13 }
 0x998   : > { %v1551_v9 = vpop.xlane.xlu1 %1550 }
 0x999   : > { %v1552_v14 = vmul.f32 %v1551_v9, %v4048_v16 }
 0x99b   : > { %v1553_v15 = vadd.f32 1e-12, %v1552_v14 }
 0x99d   : > { %3576 = vrsqrt.f32 %v1553_v15  ;;  %vm1560_vm3 = vweird.f32 %v1553_v15 }
 0x9a3   : > { %v3577_v17 = vpop.eup %3576 }
 0x9a4   : > { %v1555_v18 = vmul.f32 %v3577_v17, %v1553_v15  ;;  %vm1561_vm2 = vweird.f32 %v3577_v17 }
 0x9a5   : > { %vm1562_vm7 = vmor %vm1560_vm3, %vm1561_vm2 }
 0x9a6   : > { %v1556_v20 = vmul.f32 %v3577_v17, %v1555_v18 }
 0x9a8   : > { %v1557_v21 = vmul.f32 0.5, %v1556_v20 }
 0x9aa   : > { %v1558_v22 = vsub.f32 1.5, %v1557_v21 }
 0x9ac   : > { %v1559_v23 = vmul.f32 %v3577_v17, %v1558_v22 }
 0x9ae   : > { %v1563_v25 = vsel %vm1562_vm7, %v3577_v17, %v1559_v23 }
 0x9af   : > { %v1564_v26 = vmul.f32 %v1563_v25, %v4221_v11 }
 0x9b1   : > { %v1568_v28 = vmul.f32 %v3550_v24, %v1564_v26 }
 0x9b3   : > { %v4233_v29 = vadd.f32 %v3551_v27, %v1568_v28 }
 0x9b5   : > { %v1606_v30 = vpack.c.bf16 %v4233_v29, %v4233_v29 }
 0x9b7   : > { %1752 = vmatmul.bf16.vlgmr.msra.gmra.mxu2 %v1606_v30  ;;  %1765 = vmatmul.bf16.vlgmr.msrb.gmra.mxu3 %v1606_v30 }
 0x9b8   : > { %1778 = vmatmul.bf16.vlgmr.msra.gmra.mxu0 %v1606_v30 }
 0xa35   : > { %v1779_v33 = vpop.f32.mrf.mxu0 }
 0xa36   : > { %v1780_v11 = vadd.f32 %v1779_v33, %v1612_v32 }
 0xa38   : > { %v1785_v37 = vpack.c.bf16 %v1780_v11, %v1780_v11 }
 0xa3a   : > { %v1836_v38 = vsel %vm1026_vm5, %v1785_v37, 0  ;;  %v1753_v39 = vpop.f32.mrf.mxu2  ;;  %v1766_v40 = vpop.f32.mrf.mxu3 }
 0xa3b   : > { %v1754_v19 = vadd.f32 %v1753_v39, %v1610_v34  ;;  %v1767_v41 = vadd.f32 %v1766_v40, %v1611_v35  ;;  %1845 = vmatpush.bf16.msrb.mxu2 %v1836_v38  ;;  %v3398_v40 = vld [vmem:[#allocation5 + $0x78] sm:$0xff] }
 0xa3d   : > { %v1783_v42 = vpack.c.bf16 %v1754_v19, %v1754_v19  ;;  %v1784_v43 = vpack.c.bf16 %v1767_v41, %v1767_v41  ;;  %v1781_v44 = vpop.f32.mrf.mxu0  ;;  %v3397_v19 = vld [vmem:[#allocation5 + $0x70] sm:$0xff]  ;;  %v3396_v41 = vld [vmem:[#allocation5 + $0x68] sm:$0xff] }
 0xa3e   : > { %v3393_v44 = vld [vmem:[#allocation5 + $0x50] sm:$0xff] }
 0xa3f   : > { %v1790_v45 = vsel %vm972_vm4, %v1784_v43, 0  ;;  %1855 = vrot.lane.b32.xlu0 %v1784_v43, %s3830_s26  ;;  %1852 = vrot.lane.b32.xlu1 %v1783_v42, %s3830_s26  ;;  %v3394_v43 = vld [vmem:[#allocation5 + $0x58] sm:$0xff] }
 0xa40   : > { %1799 = vmatpush.bf16.xpose.msrb.mxu1 %v1790_v45  ;;  %v3392_v45 = vld [vmem:[#allocation5 + $0x48] sm:$0xff] }
 0xa42   : > { %v1755_v46 = vpop.f32.mrf.mxu2  ;;  %v1768_v47 = vpop.f32.mrf.mxu3 }
 0xa47   : > { %3050 = vmatmul.msk.bf16.vlgmr.msrb.gmra.mxu1 %vm972_vm4, %v1783_v42  ;;  %v3395_v42 = vld [vmem:[#allocation5 + $0x60] sm:$0xff] }
 0xa48   : > { %2001 = vmatpush.bf16.msra.mxu1 %v3398_v40  ;;  %v3108_v40 = vld [vmem:[%s4439_s10 + $0x80] sm:$0xf] }
 0xa4c   : > { %2002 = vmatpush.bf16.msra.mxu1 %v3397_v19  ;;  %v3400_v19 = vld [vmem:[%s4439_s10 + $0x84] sm:$0xf0] }
 0xa50   : > { %2003 = vmatpush.bf16.msra.mxu1 %v3396_v41 }
 0xa54   : > { %2004 = vmatpush.bf16.msra.mxu1 %v3395_v42  ;;  %v3399_v42 = vld [vmem:[%s4439_s10 + $0x84] sm:$0xf] }
 0xa58   : > { %2005 = vmatpush.bf16.msra.mxu1 %v3394_v43  ;;  %v3110_v43 = vld [vmem:[%s4439_s10 + $0x88] sm:$0xf0] }
 0xa5c   : > { %2006 = vmatpush.bf16.msra.mxu1 %v3393_v44  ;;  %v3109_v44 = vor.u32 %v3400_v19, %v3108_v40 }
 0xa60   : > { %2007 = vmatpush.bf16.msra.mxu1 %v3392_v45  ;;  %v3113_v45 = vor.u32 %v3399_v42, %v3110_v43 }
 0xab1   : > { %v1856_v48 = vpop.permute.xlu0 %1855  ;;  %v1853_v50 = vpop.permute.xlu1 %1852 }
 0xab2   : > { %v1861_v49 = vsel %vm972_vm4, %v1856_v48, 0  ;;  %v3391_v48 = vld [vmem:[#allocation5 + $0x40] sm:$0xff] }
 0xab3   : > { %1870 = vmatpush.bf16.xpose.msra.mxu3 %v1861_v49  ;;  %2008 = vmatpush.bf16.msra.mxu1 %v3391_v48 }
 0xaba   : > { %3052 = vmatmul.msk.bf16.vlgmr.msra.gmra.mxu3 %vm972_vm4, %v1853_v50 }
 0xac4   : > { %v1801_v51 = vpop.f32.mrf.mxu1 }
 0xac5   : > { %v1805_v52 = vmul.f32 0.125, %v1801_v51 }
 0xac7   : > { %v1806_v53 = vadd.f32 %v4083_v60, %v1805_v52  ;;  %v3552_v52 = vld [vmem:[%s4436_s7 + $0x1] ss:$0 sm:$0xff] }
 0xac9   : > { %v1807_v54 = vsel %vm997_vm6, %v1806_v53, -inf }
 0xaca   : > { %1808 = vmax.xlane.f32.xlu2 %v1807_v54 }
 0xacc   : > { %v1803_v55 = vpop.f32.mrf.mxu1 }
 0xae2   : > { %1904 = vrot.lane.b32.xlu2 %v1785_v37, %s3830_s26 }
 0xb3d   : > { %v1872_v56 = vpop.f32.mrf.mxu3  ;;  %v1809_v57 = vpop.xlane.xlu2 %1808 }
 0xb3e   : > { %v1876_v58 = vmul.f32 0.125, %v1872_v56  ;;  %v1810_v59 = vsub.f32 %v1806_v53, %v1809_v57  ;;  %v3164_v57 = vld [vmem:[%s4439_s10 + $0xf0] sm:$0xf] }
 0xb40   : > { %v1811_v61 = vmul.f32 1.442695, %v1810_v59  ;;  %v1877_v62 = vadd.f32 %v4083_v60, %v1876_v58  ;;  %v3414_v58 = vld [vmem:[%s4439_s10 + $0xf4] sm:$0xf0]  ;;  %v3413_v59 = vld [vmem:[%s4439_s10 + $0xf4] sm:$0xf] }
 0xb42   : > { %3578 = vpow2.f32 %v1811_v61  ;;  %v1878_v63 = vsel %vm997_vm6, %v1877_v62, -inf  ;;  %v3165_v61 = vor.u32 %v3414_v58, %v3164_v57  ;;  %v3553_v57 = vld [vmem:[%s4437_s8 + $0x1] ss:$0 sm:$0xff] }
 0xb43   : > { %1879 = vmax.xlane.f32.xlu0 %v1878_v63 }
 0xb44   : > { %2152 = vmatpush.bf16.msra.mxu2 %v3165_v61  ;;  %v3554_v61 = vld [vmem:[%s4438_s9 + $0x1] ss:$0 sm:$0xff] }
 0xb45   : > { %v1874_v0 = vpop.f32.mrf.mxu3  ;;  %v1905_v1 = vpop.permute.xlu2 %1904 }
 0xb46   : > { %v1910_v2 = vsel %vm1026_vm5, %v1905_v1, 0 }
 0xb47   : > { %1919 = vmatpush.bf16.msrb.mxu0 %v1910_v2 }
 0xb48   : > { %v3579_v3 = vpop.eup %3578 }
 0xb49   : > { %v1813_v4 = vsel %vm997_vm6, %v3579_v3, 0.0 }
 0xb4b   : > { %1814 = vadd.xlane.f32.xlu0 %v1813_v4  ;;  %v3412_v4 = vld [vmem:[%s4439_s10 + $0xe4] sm:$0xf0] }
 0xbb6   : > { %v1880_v5 = vpop.xlane.xlu0 %1879 }
 0xbb7   : > { %v1881_v6 = vsub.f32 %v1877_v62, %v1880_v5  ;;  %v3166_v62 = vld [vmem:[%s4439_s10 + $0xf8] sm:$0xf0]  ;;  %v3411_v5 = vld [vmem:[%s4439_s10 + $0xe4] sm:$0xf] }
 0xbb9   : > { %v1882_v36 = vmul.f32 1.442695, %v1881_v6 }
 0xbbb   : > { %3580 = vpow2.f32 %v1882_v36  ;;  %v3158_v36 = vld [vmem:[%s4439_s10 + $0xe8] sm:$0xf0] }
 0xbbe   : > { %v1815_v8 = vpop.xlane.xlu0 %1814 }
 0xbbf   : > { %3582 = vrcp.f32 %v1815_v8  ;;  %v1827_v9 = vand.u32 2147483648, %v1815_v8  ;;  %v1825_v15 = vand.u32 2147483647, %v1815_v8  ;;  %vm1821_vm8 = vweird.f32 %v1815_v8 }
 0xbc1   : > { %v3581_v60 = vpop.eup %3580  ;;  %v1828_v18 = vor.u32 1.1754944e-38, %v1827_v9  ;;  %vm1826_vm10 = vcmp.eq.f32.partialorder %v1825_v15, 8.507059e+37  ;;  %v3408_v15 = vld [vmem:[%s4439_s10 + $0xc4] sm:$0xf0] }
 0xbc2   : > { %v1884_v10 = vsel %vm997_vm6, %v3581_v60, 0.0 }
 0xbc3   : > { %1885 = vadd.xlane.f32.xlu1 %v1884_v10  ;;  %v3410_v10 = vld [vmem:[%s4439_s10 + $0xd4] sm:$0xf0] }
 0xbc5   : > { %v3583_v7 = vpop.eup %3582 }
 0xbc6   : > { %v1817_v12 = vmul.f32 %v3583_v7, %v1815_v8  ;;  %vm1822_vm5 = vweird.f32 %v3583_v7  ;;  %v3161_v8 = vor.u32 %v3411_v5, %v3158_v36  ;;  %v3427_v5 = vld [vmem:[#allocation7 + $0xe0] sm:$0xff]  ;;  %v3426_v36 = vld [vmem:[#allocation7 + $0xd8] sm:$0xff] }
 0xbc7   : > { %vm1823_vm9 = vmor %vm1821_vm8, %vm1822_vm5 }
 0xbc8   : > { %v1818_v13 = vsub.f32 1.0, %v1817_v12 }
 0xbca   : > { %v1819_v14 = vmul.f32 %v3583_v7, %v1818_v13  ;;  %v3150_v13 = vld [vmem:[%s4439_s10 + $0xd8] sm:$0xf0] }
 0xbcc   : > { %v1820_v17 = vadd.f32 %v3583_v7, %v1819_v14  ;;  %v3140_v14 = vld [vmem:[%s4439_s10 + $0xc0] sm:$0xf] }
 0xbce   : > { %v1824_v20 = vsel %vm1823_vm9, %v3583_v7, %v1820_v17  ;;  %v3409_v7 = vld [vmem:[%s4439_s10 + $0xd4] sm:$0xf]  ;;  %v3407_v17 = vld [vmem:[%s4439_s10 + $0xc4] sm:$0xf] }
 0xbcf   : > { %v1829_v21 = vsel %vm1826_vm10, %v1828_v18, %v1824_v20  ;;  %v3153_v9 = vor.u32 %v3409_v7, %v3150_v13  ;;  %v3141_v18 = vor.u32 %v3408_v15, %v3140_v14  ;;  %v3142_v20 = vld [vmem:[%s4439_s10 + $0xc8] sm:$0xf0]  ;;  %v3423_v13 = vld [vmem:[#allocation7 + $0xc0] sm:$0xff] }
 0xbd0   : > { %v1830_v22 = vmul.f32 %v3579_v3, %v1829_v21  ;;  %v3156_v3 = vld [vmem:[%s4439_s10 + $0xe0] sm:$0xf]  ;;  %v3145_v21 = vor.u32 %v3407_v17, %v3142_v20  ;;  %v3424_v7 = vld [vmem:[#allocation7 + $0xc8] sm:$0xff] }
 0xbd1   : > { %v3157_v6 = vor.u32 %v3412_v4, %v3156_v3  ;;  %v3420_v3 = vld [vmem:[#allocation7 + $0xa8] sm:$0xff] }
 0xbd2   : > { %v1831_v23 = vpack.c.bf16 %v1830_v22, %v1830_v22  ;;  %v3132_v22 = vld [vmem:[%s4439_s10 + $0xb0] sm:$0xf]  ;;  %v3428_v4 = vld [vmem:[#allocation7 + $0xe8] sm:$0xff] }
 0xbd3   : > { %2153 = vmatpush.bf16.msra.mxu2 %v3157_v6  ;;  %v3418_v6 = vld [vmem:[#allocation7 + $0x98] sm:$0xff] }
 0xbd4   : > { %3051 = vmatmul.msk.bf16.vlgmr.msrb.gmra.mxu2 %vm997_vm6, %v1831_v23  ;;  %v3406_v23 = vld [vmem:[%s4439_s10 + $0xb4] sm:$0xf0] }
 0xc36   : > { %v1886_v24 = vpop.xlane.xlu1 %1885 }
 0xc37   : > { %3584 = vrcp.f32 %v1886_v24  ;;  %v1898_v28 = vand.u32 2147483648, %v1886_v24  ;;  %v1896_v31 = vand.u32 2147483647, %v1886_v24  ;;  %vm1892_vm12 = vweird.f32 %v1886_v24 }
 0xc39   : > { %v1899_v33 = vor.u32 1.1754944e-38, %v1898_v28  ;;  %vm1897_vm14 = vcmp.eq.f32.partialorder %v1896_v31, 8.507059e+37  ;;  %v3124_v28 = vld [vmem:[%s4439_s10 + $0xa0] sm:$0xf]  ;;  %v3403_v31 = vld [vmem:[%s4439_s10 + $0xa4] sm:$0xf] }
 0xc3d   : > { %v3585_v25 = vpop.eup %3584 }
 0xc3e   : > { %v1888_v26 = vmul.f32 %v3585_v25, %v1886_v24  ;;  %vm1893_vm11 = vweird.f32 %v3585_v25  ;;  %v3405_v24 = vld [vmem:[%s4439_s10 + $0xb4] sm:$0xf] }
 0xc3f   : > { %vm1894_vm13 = vmor %vm1892_vm12, %vm1893_vm11 }
 0xc40   : > { %v1889_v27 = vsub.f32 1.0, %v1888_v26  ;;  %v3134_v26 = vld [vmem:[%s4439_s10 + $0xb8] sm:$0xf0] }
 0xc42   : > { %v1890_v30 = vmul.f32 %v3585_v25, %v1889_v27  ;;  %v3137_v27 = vor.u32 %v3405_v24, %v3134_v26 }
 0xc44   : > { %v1891_v32 = vadd.f32 %v3585_v25, %v1890_v30  ;;  %v3404_v30 = vld [vmem:[%s4439_s10 + $0xa4] sm:$0xf0] }
 0xc46   : > { %v1895_v11 = vsel %vm1894_vm13, %v3585_v25, %v1891_v32  ;;  %v3133_v25 = vor.u32 %v3406_v23, %v3132_v22  ;;  %v3125_v32 = vor.u32 %v3404_v30, %v3124_v28 }
 0xc47   : > { %v1900_v34 = vsel %vm1897_vm14, %v1899_v33, %v1895_v11  ;;  %v3126_v33 = vld [vmem:[%s4439_s10 + $0xa8] sm:$0xf0] }
 0xc48   : > { %v1901_v35 = vmul.f32 %v3581_v60, %v1900_v34  ;;  %v3148_v60 = vld [vmem:[%s4439_s10 + $0xd0] sm:$0xf]  ;;  %v3129_v11 = vor.u32 %v3403_v31, %v3126_v33 }
 0xc49   : > { %v3149_v12 = vor.u32 %v3410_v10, %v3148_v60  ;;  %v3116_v34 = vld [vmem:[%s4439_s10 + $0x90] sm:$0xf]  ;;  %v3416_v10 = vld [vmem:[#allocation7 + $0x88] sm:$0xff] }
 0xc4a   : > { %v1902_v37 = vpack.c.bf16 %v1901_v35, %v1901_v35  ;;  %v3402_v35 = vld [vmem:[%s4439_s10 + $0x94] sm:$0xf0]  ;;  %v3425_v60 = vld [vmem:[#allocation7 + $0xd0] sm:$0xff] }
 0xc4b   : > { %2154 = vmatpush.bf16.msra.mxu2 %v3149_v12  ;;  %v3415_v12 = vld [vmem:[#allocation7 + $0x80] sm:$0xff] }
 0xc4c   : > { %3053 = vmatmul.msk.bf16.vlgmr.msrb.gmra.mxu0 %vm997_vm6, %v1902_v37  ;;  %v3401_v37 = vld [vmem:[%s4439_s10 + $0x94] sm:$0xf] }
 0xc4f   : > { %2155 = vmatpush.bf16.msra.mxu2 %v3141_v18 }
 0xc53   : > { %2156 = vmatpush.bf16.msra.mxu2 %v3133_v25 }
 0xc57   : > { %v1847_v38 = vpop.f32.mrf.mxu2  ;;  %2157 = vmatpush.bf16.msra.mxu2 %v3125_v32 }
 0xc5f   : > { %v1849_v39 = vpop.f32.mrf.mxu2 }
 0xc60   : > { %v3118_v39 = vld [vmem:[%s4439_s10 + $0x98] sm:$0xf0] }
 0xc61   : > { %v3121_v41 = vor.u32 %v3401_v37, %v3118_v39 }
 0xcc9   : > { %v1921_v46 = vpop.f32.mrf.mxu0 }
 0xcca   : > { %1926 = vrot.lane.b32.xlu2 %v1921_v46, %s3830_s26  ;;  %v3422_v46 = vld [vmem:[#allocation7 + $0xb8] sm:$0xff]  ;;  %s2562_s26 = sshll.u32 %s713_s24, 4  ;;  %s2563_s26 = int_to_ptr.vmem [resolvable:$true] %s2562_s26 }
 0xccb   : > { %2332 = vmatpush.bf16.msra.mxu0 %v3422_v46 }
 0xcd1   : > { %v1923_v47 = vpop.f32.mrf.mxu0 }
 0xcd2   : > { %v3430_v47 = vld [vmem:[#allocation7 + $0xf8] sm:$0xff] }
 0xcd3   : > { %2345 = vmatpush.bf16.msrb.mxu1 %v3430_v47 }
 0xd24   : > { %v1927_v49 = vpop.permute.xlu2 %1926 }
 0xd25   : > { %v1929_v50 = vsel %vm972_vm4, %v1847_v38, %v1927_v49  ;;  %v3117_v38 = vor.u32 %v3402_v35, %v3116_v34 }
 0xd26   : > { %v1947_v51 = vpack.c.bf16 %v1929_v50, %v1929_v50 }
 0xd27   : > { %2158 = vmatpush.bf16.msra.mxu2 %v3117_v38 }
 0xd28   : > { %2009 = vmatmul.bf16.vlgmr.msra.gmra.mxu1 %v1947_v51 }
 0xd2b   : > { %2159 = vmatpush.bf16.msra.mxu2 %v3109_v44  ;;  %v3555_v44 = vld [vmem:[%s4442_s13 + $0x1] ss:$0 sm:$0xff] }
 0xda5   : > { %v2010_v53 = vpop.f32.mrf.mxu1 }
 0xda6   : > { %v2011_v54 = vadd.f32 %v3552_v52, %v2010_v53 }
 0xda8   : > { %v2014_v55 = vadd.f32 %v2011_v54, %v4233_v29  ;;  %v3169_v29 = vor.u32 %v3413_v59, %v3166_v62 }
 0xdaa   : > { %2019 = vadd.xlane.f32.xlu0 %v2014_v55  ;;  %2165 = vmatpush.bf16.msrb.mxu3 %v3169_v29 }
 0xdad   : > { %v2012_v56 = vpop.f32.mrf.mxu1 }
 0xdae   : > { %2166 = vmatpush.bf16.msrb.mxu3 %v3161_v8  ;;  %v3417_v8 = vld [vmem:[#allocation7 + $0x90] sm:$0xff] }
 0xdb2   : > { %2167 = vmatpush.bf16.msrb.mxu3 %v3153_v9  ;;  %v3105_v9 = vld [vmem:[%s4440_s11 + $0x2] sm:$0x3] }
 0xdb3   : > { %v2068_v14 = vperm.slane %v3105_v9, 0  ;;  %v2069_v15 = vperm.slane %v3105_v9, 1 }
 0xdb6   : > { %2168 = vmatpush.bf16.msrb.mxu3 %v3145_v21 }
 0xdba   : > { %2169 = vmatpush.bf16.msrb.mxu3 %v3137_v27 }
 0xdbe   : > { %2170 = vmatpush.bf16.msrb.mxu3 %v3129_v11 }
 0xdc2   : > { %2171 = vmatpush.bf16.msrb.mxu3 %v3121_v41 }
 0xdc6   : > { %2172 = vmatpush.bf16.msrb.mxu3 %v3113_v45 }
 0xe1d   : > { %v2020_v63 = vpop.xlane.xlu0 %2019 }
 0xe1e   : > { %v2021_v0 = vmul.f32 %v2020_v63, %v4048_v16 }
 0xe20   : > { %v4276_v1 = vsub.f32 %v2014_v55, %v2021_v0  ;;  %v3421_v0 = vld [vmem:[#allocation7 + $0xb0] sm:$0xff] }
 0xe21   : > { %2333 = vmatpush.bf16.msra.mxu0 %v3421_v0  ;;  %v3446_v0 = vld [vmem:[#allocation10 + $0x38] sm:$0xff] }
 0xe22   : > { %v2023_v2 = vmul.f32 %v4276_v1, %v4276_v1  ;;  %2537 = vmatpush.bf16.msra.mxu3 %v3446_v0 }
 0xe24   : > { %2024 = vadd.xlane.f32.xlu2 %v2023_v2  ;;  %v3429_v2 = vld [vmem:[#allocation7 + $0xf0] sm:$0xff] }
 0xe25   : > { %2346 = vmatpush.bf16.msrb.mxu1 %v3429_v2  ;;  %2334 = vmatpush.bf16.msra.mxu0 %v3420_v3 }
 0xe29   : > { %2347 = vmatpush.bf16.msrb.mxu1 %v3428_v4  ;;  %v3445_v4 = vld [vmem:[#allocation10 + $0x30] sm:$0xff] }
 0xe2a   : > { %2538 = vmatpush.bf16.msra.mxu3 %v3445_v4 }
 0xe2d   : > { %2348 = vmatpush.bf16.msrb.mxu1 %v3427_v5  ;;  %v3444_v5 = vld [vmem:[#allocation10 + $0x28] sm:$0xff] }
 0xe2e   : > { %2539 = vmatpush.bf16.msra.mxu3 %v3444_v5 }
 0xe31   : > { %2349 = vmatpush.bf16.msrb.mxu1 %v3426_v36 }
 0xe35   : > { %2350 = vmatpush.bf16.msrb.mxu1 %v3425_v60  ;;  %v3442_v60 = vld [vmem:[#allocation10 + $0x18] sm:$0xff] }
 0xe39   : > { %2351 = vmatpush.bf16.msrb.mxu1 %v3424_v7 }
 0xe3d   : > { %2352 = vmatpush.bf16.msrb.mxu1 %v3423_v13 }
 0xe97   : > { %v2025_v48 = vpop.xlane.xlu2 %2024 }
 0xe98   : > { %v2026_v49 = vmul.f32 %v2025_v48, %v4048_v16 }
 0xe9a   : > { %v2027_v50 = vadd.f32 1e-12, %v2026_v49 }
 0xe9c   : > { %3586 = vrsqrt.f32 %v2027_v50  ;;  %vm2034_vm6 = vweird.f32 %v2027_v50 }
 0xea2   : > { %v3587_v51 = vpop.eup %3586 }
 0xea3   : > { %v2029_v52 = vmul.f32 %v3587_v51, %v2027_v50  ;;  %vm2035_vm4 = vweird.f32 %v3587_v51 }
 0xea4   : > { %vm2036_vm15 = vmor %vm2034_vm6, %vm2035_vm4 }
 0xea5   : > { %v2030_v53 = vmul.f32 %v3587_v51, %v2029_v52  ;;  %v3438_v52 = vld [vmem:[#allocation8 + $0x38] sm:$0xff] }
 0xea6   : > { %2457 = vmatpush.bf16.msrb.mxu2 %v3438_v52 }
 0xea7   : > { %v2031_v54 = vmul.f32 0.5, %v2030_v53 }
 0xea9   : > { %v2032_v55 = vsub.f32 1.5, %v2031_v54 }
 0xeab   : > { %v2033_v56 = vmul.f32 %v3587_v51, %v2032_v55 }
 0xead   : > { %v2037_v58 = vsel %vm2036_vm15, %v3587_v51, %v2033_v56 }
 0xeae   : > { %v2038_v59 = vmul.f32 %v2037_v58, %v4276_v1  ;;  %v3419_v1 = vld [vmem:[#allocation7 + $0xa0] sm:$0xff]  ;;  %v3436_v58 = vld [vmem:[#allocation8 + $0x28] sm:$0xff] }
 0xeaf   : > { %2335 = vmatpush.bf16.msra.mxu0 %v3419_v1 }
 0xeb0   : > { %v2042_v62 = vmul.f32 %v3553_v57, %v2038_v59  ;;  %v3437_v57 = vld [vmem:[#allocation8 + $0x30] sm:$0xff]  ;;  %v3435_v59 = vld [vmem:[#allocation8 + $0x20] sm:$0xff] }
 0xeb1   : > { %2458 = vmatpush.bf16.msrb.mxu2 %v3437_v57 }
 0xeb2   : > { %v4372_v29 = vadd.f32 %v3554_v61, %v2042_v62  ;;  %v3434_v61 = vld [vmem:[#allocation8 + $0x18] sm:$0xff]  ;;  %v3433_v62 = vld [vmem:[#allocation8 + $0x10] sm:$0xff] }
 0xeb3   : > { %2336 = vmatpush.bf16.msra.mxu0 %v3418_v6  ;;  %v3443_v6 = vld [vmem:[#allocation10 + $0x20] sm:$0xff] }
 0xeb4   : > { %v2064_v63 = vpack.c.bf16 %v4372_v29, %v4372_v29  ;;  %2540 = vmatpush.bf16.msra.mxu3 %v3443_v6 }
 0xeb5   : > { %2459 = vmatpush.bf16.msrb.mxu2 %v3436_v58 }
 0xeb6   : > { %2160 = vmatmul.bf16.vlgmr.msra.gmra.mxu2 %v2064_v63  ;;  %2173 = vmatmul.bf16.vlgmr.msrb.gmra.mxu3 %v2064_v63  ;;  %v3431_v63 = vld [vmem:[#allocation8] sm:$0xff] }
 0xeb7   : > { %2337 = vmatpush.bf16.msra.mxu0 %v3417_v8 }
 0xeb8   : > { %2541 = vmatpush.bf16.msra.mxu3 %v3442_v60 }
 0xeb9   : > { %2460 = vmatpush.bf16.msrb.mxu2 %v3435_v59 }
 0xebb   : > { %2338 = vmatpush.bf16.msra.mxu0 %v3416_v10 }
 0xebd   : > { %2461 = vmatpush.bf16.msrb.mxu2 %v3434_v61 }
 0xebf   : > { %2339 = vmatpush.bf16.msra.mxu0 %v3415_v12  ;;  %v3441_v12 = vld [vmem:[#allocation10 + $0x10] sm:$0xff] }
 0xec0   : > { %2542 = vmatpush.bf16.msra.mxu3 %v3441_v12 }
 0xec1   : > { %2462 = vmatpush.bf16.msrb.mxu2 %v3433_v62 }
 0xf39   : > { %v2161_v17 = vpop.f32.mrf.mxu2  ;;  %v2174_v18 = vpop.f32.mrf.mxu3 }
 0xf3a   : > { %v2162_v20 = vadd.f32 %v2161_v17, %v2068_v14  ;;  %v2175_v21 = vadd.f32 %v2174_v18, %v2069_v15  ;;  %v3557_v17 = vld [vmem:[%s4444_s15 + $0x1] ss:$0 sm:$0xff] }
 0xf3c   : > { %v2178_v22 = vmul.f32 %v2162_v20, %v2162_v20  ;;  %v2179_v23 = vmul.f32 %v2175_v21, %v2175_v21 }
 0xf3e   : > { %v2180_v24 = vmul.f32 %v2178_v22, %v2162_v20  ;;  %v2181_v25 = vmul.f32 %v2179_v23, %v2175_v21  ;;  %v3440_v22 = vld [vmem:[#allocation10 + $0x8] sm:$0xff]  ;;  %v3439_v23 = vld [vmem:[#allocation10] sm:$0xff] }
 0xf3f   : > { %2543 = vmatpush.bf16.msra.mxu3 %v3440_v22 }
 0xf40   : > { %v2182_v26 = vmul.f32 0.044715, %v2180_v24  ;;  %v2183_v27 = vmul.f32 0.044715, %v2181_v25  ;;  %v2408_v24 = vld [vmem:[%s4491_s4] sm:$0x1] }
 0xf41   : > { %v2163_v28 = vpop.f32.mrf.mxu2  ;;  %v2176_v30 = vpop.f32.mrf.mxu3 }
 0xf42   : > { %v2184_v31 = vadd.f32 %v2182_v26, %v2162_v20  ;;  %v2185_v32 = vadd.f32 %v2183_v27, %v2175_v21 }
 0xf43   : > { %2544 = vmatpush.bf16.msra.mxu3 %v3439_v23 }
 0xf44   : > { %v2186_v33 = vmul.f32 0.7978846, %v2184_v31  ;;  %v2187_v11 = vmul.f32 0.7978846, %v2185_v32  ;;  %v2488_v31 = vld [vmem:[%s4494_s1] sm:$0x1] }
 0xf46   : > { %3588 = vtanh.f32 %v2186_v33 }
 0xf47   : > { %3590 = vtanh.f32 %v2187_v11 }
 0xf4c   : > { %v3589_v34 = vpop.eup %3588 }
 0xf4d   : > { %v3591_v35 = vpop.eup %3590  ;;  %v2190_v37 = vadd.f32 1.0, %v3589_v34 }
 0xf4e   : > { %v2191_v38 = vadd.f32 1.0, %v3591_v35 }
 0xf4f   : > { %v2192_v39 = vmul.f32 0.5, %v2190_v37 }
 0xf50   : > { %v2193_v40 = vmul.f32 0.5, %v2191_v38 }
 0xf51   : > { %v2194_v19 = vmul.f32 %v2192_v39, %v2162_v20 }
 0xf52   : > { %v2195_v41 = vmul.f32 %v2193_v40, %v2175_v21 }
 0xf53   : > { %v2229_v42 = vpack.c.bf16 %v2194_v19, %v2194_v19 }
 0xf54   : > { %v2230_v43 = vpack.c.bf16 %v2195_v41, %v2195_v41 }
 0xf55   : > { %2340 = vmatmul.bf16.vlgmr.msra.gmra.mxu0 %v2229_v42 }
 0xf56   : > { %2353 = vmatmul.bf16.vlgmr.msrb.gmra.mxu1 %v2230_v43 }
 0xfd2   : > { %v2341_v45 = vpop.f32.mrf.mxu0 }
 0xfd3   : > { %v2342_v46 = vadd.f32 %v3555_v44, %v2341_v45  ;;  %v2354_v47 = vpop.f32.mrf.mxu1 }
 0xfd5   : > { %v2355_v48 = vadd.f32 %v2354_v47, %v2342_v46 }
 0xfd7   : > { %v2358_v49 = vadd.f32 %v2355_v48, %v4372_v29  ;;  %v3432_v29 = vld [vmem:[#allocation8 + $0x8] sm:$0xff] }
 0xfd8   : > { %2463 = vmatpush.bf16.msrb.mxu2 %v3432_v29 }
 0xfd9   : > { %2363 = vadd.xlane.f32.xlu0 %v2358_v49 }
 0xfda   : > { %v2343_v50 = vpop.f32.mrf.mxu0 }
 0xfdb   : > { %v2356_v51 = vpop.f32.mrf.mxu1 }
 0xfdc   : > { %2464 = vmatpush.bf16.msrb.mxu2 %v3431_v63 }
0x104c   : > { %v2364_v53 = vpop.xlane.xlu0 %2363 }
0x104d   : > { %v2365_v54 = vmul.f32 %v2364_v53, %v4048_v16 }
0x104f   : > { %v2366_v55 = vsub.f32 %v2358_v49, %v2365_v54 }
0x1051   : > { %v2367_v56 = vmul.f32 %v2366_v55, %v2366_v55 }
0x1053   : > { %2368 = vadd.xlane.f32.xlu1 %v2367_v56 }
0x10c6   : > { %v2369_v2 = vpop.xlane.xlu1 %2368 }
0x10c7   : > { %v2370_v3 = vmul.f32 %v2369_v2, %v4048_v16  ;;  %v3556_v16 = vld [vmem:[%s4443_s14 + $0x1] ss:$0 sm:$0xff] }
0x10c9   : > { %v2371_v1 = vadd.f32 1e-12, %v2370_v3 }
0x10cb   : > { %3592 = vrsqrt.f32 %v2371_v1  ;;  %vm2378_vm1 = vweird.f32 %v2371_v1 }
0x10d1   : > { %v3593_v36 = vpop.eup %3592 }
0x10d2   : > { %v2373_v8 = vmul.f32 %v3593_v36, %v2371_v1  ;;  %vm2379_vm0 = vweird.f32 %v3593_v36 }
0x10d3   : > { %vm2380_vm2 = vmor %vm2378_vm1, %vm2379_vm0 }
0x10d4   : > { %v2374_v10 = vmul.f32 %v3593_v36, %v2373_v8 }
0x10d6   : > { %v2375_v7 = vmul.f32 0.5, %v2374_v10 }
0x10d8   : > { %v2376_v13 = vsub.f32 1.5, %v2375_v7 }
0x10da   : > { %v2377_v9 = vmul.f32 %v3593_v36, %v2376_v13 }
0x10dc   : > { %v2381_v14 = vsel %vm2380_vm2, %v3593_v36, %v2377_v9 }
0x10dd   : > { %v2382_v15 = vmul.f32 %v2381_v14, %v2366_v55 }
0x10df   : > { %v2386_v18 = vmul.f32 %v3556_v16, %v2382_v15 }
0x10e1   : > { %v2390_v20 = vadd.f32 %v3557_v17, %v2386_v18 }
0x10e3   : > { %v2407_v21 = vpack.c.bf16 %v2390_v20, %v2390_v20 }
0x10e5   : > { %2465 = vmatmul.bf16.vlgmr.msrb.gmra.mxu2 %v2407_v21 }
0x1168   : > { %v2466_v25 = vpop.f32.mrf.mxu2 }
0x1169   : > { %v2467_v26 = vadd.f32 %v2466_v25, %v2408_v24 }
0x116b   : > { %v2470_v27 = vmax.f32 %v2467_v26, 0.0 }
0x116d   : > { %v2487_v28 = vpack.c.bf16 %v2470_v27, %v2470_v27 }
0x116f   : > { %2545 = vmatmul.bf16.vlgmr.msra.gmra.mxu3 %v2487_v28 }
0x1170   : > { %v2468_v30 = vpop.f32.mrf.mxu2 }
0x11f2   : > { %v2546_v32 = vpop.f32.mrf.mxu3 }
0x11f3   : > { %v2547_v33 = vadd.f32 %v2546_v32, %v2488_v31 }
0x11f5   : > { %2550 = vst [vmem:[%s713_s24] sm:$0x1] %v2547_v33 }
0x11f6   : > { %3771 = shalt.err (!%p3768_p8)
}
0x11f7   : > { %3467 = dma.vmem_to_hbm [thread:$0]  (%p3974_p5), %s2563_s26, 16, %s2565_s29, %s2552_s17  }
0x11fa   : > { %v2548_v11 = vpop.f32.mrf.mxu3 }
0x11fb PF: > { %s4495_s30 = sld [smem:[#allocation19_spill]] }
0x11fc   : > { %s4496_s23 = sld [smem:[#allocation16_spill]] }
0x1201   : > { %p3499_p9 = scmp.ge.s32.totalorder %s4495_s30, 2 }
0x1202   : > { %s2576_s6 = sand.u32 1, %s4496_s23  }
0x1203   : > { %p3486_p10 = pnand %p3499_p9, %p3978_p6  ;;  %s2577_s19 = scalar_lea.sflag [#allocation4], %s2576_s6 }
0x1205   : > { %p3487_p11 = pneg %p3486_p10 }
0x1207   : > { %3801 = dma.done.wait (%p3487_p11), %s2577_s19, 16  }
0x1208   : > { %3803 = vsyncadd (%p3487_p11), %s2577_s19, 4294967280  ;;  %s4498_s24 = sld [smem:[#allocation20_spill]] }
0x1209   : > { %s4499_s1 = sld [smem:[#allocation17_spill]] }
0x120a   : > { %s4500_s22 = sld [smem:[#allocation18_spill]] }
0x120b   : > { %s4501_s23 = sld [smem:[#allocation21_spill]] }
0x120e   : > { %p33_p12 = scmp.ge.s32.totalorder %s4498_s24, 4  }
0x1210   :  { %35 = sbr.rel (!%p33_p12) target bundleno = 17 (0x11), region = 171 }
0x1215   :  { %2582 = vsyncpa [#allocation3], 1 }
0x1216   :  { %2584 = vsyncpa [#allocation3 + $0x1], 1 }
0x1217   :  { %2585 = vsyncpa [#allocation6], 1 }
0x1218   :  { %2586 = vsyncpa [#allocation9], 1 }
0x1219   :  { %2587 = vsyncpa [#allocation4], 1 }
0x121a   :  { %2589 = vsyncpa [#allocation4 + $0x1], 1 }

</bundles_post_ra>
